<compile_context>
chip_gen: v6e
topology: v6e:2x2x1
jax: 0.10.0
libtpu: 0.0.40
codegen_flags: <defaults>
</compile_context>

<pallas_src>
import functools

import jax
import jax.numpy as jnp
from jax.experimental import pallas as pl
from jax.experimental.pallas import tpu as pltpu


# -----------------------------------------------------------------------------
# small helpers
# -----------------------------------------------------------------------------
def _round_up(x, m):
    return ((x + m - 1) // m) * m


def _pick_tile_v(hidden, vocab, num_splits=1, w_buf_budget_bytes=16 * 1024 * 1024):
    """Largest 128-multiple vocab tile whose double-buffered bf16 W slab fits."""
    need = _round_up(max(-(-vocab // num_splits), 128), 128)
    for t in (2048, 1024, 512, 256, 128):
        if 2 * 2 * hidden * t <= w_buf_budget_bytes:   # 2 buffers x bf16 bytes
            return min(t, need)
    return 128


_I32_MIN = -(2 ** 31)


def _f32_to_ordered_i32(x):
    """Bit trick: monotone map f32 -> int32 (signed compare preserves order)."""
    b = pltpu.bitcast(x, jnp.int32)
    return jnp.where(b >= 0, b, jnp.int32(_I32_MIN) - b)


def _ordered_i32_to_f32(o):
    b = jnp.where(o >= 0, o, jnp.int32(_I32_MIN) - o)
    return pltpu.bitcast(b, jnp.float32)


# -----------------------------------------------------------------------------
# Fused kernel: decoder forward_step scores + beam pruning.
#   logits = x @ W (bf16 MXU, f32 acc), online log-sum-exp over vocab tiles,
#   per-row running top-K of raw logits (packed single-reduce argmax, gated).
# Outputs per vocab split: raw top-k values/ids + partial LSE (lane-dense).
# -----------------------------------------------------------------------------
def _fused_score_topk_kernel(x_ref, w_ref, vals_ref, idx_ref, lse_ref,
                             m_sc, s_sc, runv_sc, runi_sc, *,
                             k, tile_v, nv_per_split, v_real, mask_tail):
    sp = pl.program_id(0)                      # vocab split  (parallel)
    v = pl.program_id(2)                       # vocab tile   (arbitrary)
    tr = x_ref.shape[0]

    @pl.when(v == 0)
    def _init():
        m_sc[...] = jnp.full((tr, 1), -jnp.inf, jnp.float32)
        s_sc[...] = jnp.zeros((tr, 1), jnp.float32)
        runv_sc[...] = jnp.full((tr, k), -jnp.inf, jnp.float32)
        runi_sc[...] = jnp.zeros((tr, k), jnp.int32)

    # MXU: (TILE_R, H) @ (H, tile_v) -> f32 acc; both inputs pre-cast to bf16.
    logits = jnp.dot(x_ref[...], w_ref[...], preferred_element_type=jnp.float32)

    tile_start = (sp * nv_per_split + v) * tile_v
    lanes = jax.lax.broadcasted_iota(jnp.int32, (tr, tile_v), 1)
    if mask_tail:
        # Padded vocab columns: huge-negative (finite, so the online LSE never
        # sees a NaN even on a fully padded tile; exp underflows to exactly 0).
        logits = jnp.where(lanes + tile_start < v_real, logits,
                           jnp.float32(-1e30))

    # ---- online log-sum-exp over the vocab axis (exact log-softmax) --------
    tile_max = jnp.max(logits, axis=-1, keepdims=True)               # (TR, 1)
    m_new = jnp.maximum(m_sc[...], tile_max)
    s_sc[...] = (s_sc[...] * jnp.exp(m_sc[...] - m_new)
                 + jnp.sum(jnp.exp(logits - m_new), axis=-1, keepdims=True))
    m_sc[...] = m_new

    # ---- gated top-k extraction: skip tiles that cannot improve ------------
    kth = runv_sc[...][:, k - 1:k]                                    # (TR, 1)
    can_improve = jnp.max(tile_max - kth) > 0.0

    @pl.when(can_improve)
    def _extract():
        # One cross-lane reduce per element: order-preserving value bits with
        # the inverted lane index packed into the low bits (ties -> min lane).
        lane_bits = (tile_v - 1).bit_length()
        lmask = (1 << lane_bits) - 1
        key = ((_f32_to_ordered_i32(logits) & jnp.int32(~lmask))
               | (jnp.int32(lmask) - lanes))
        cand_v, cand_i = [], []
        work = key
        for _ in range(k):
            mk = jnp.max(work, axis=-1, keepdims=True)                # 1 reduce
            loc = jnp.int32(lmask) - (mk & jnp.int32(lmask))
            cand_v.append(_ordered_i32_to_f32(mk & jnp.int32(~lmask)))
            cand_i.append(loc + tile_start)
            work = jnp.where(lanes == loc, jnp.int32(_I32_MIN), work)

        # ---- merge with running top-k over 2k candidates (tiny) ------------
        cv = jnp.concatenate([runv_sc[...]] + cand_v, axis=1)         # (TR,2k)
        ci = jnp.concatenate([runi_sc[...]] + cand_i, axis=1)
        pbits = max(1, (2 * k - 1).bit_length())
        pmask = (1 << pbits) - 1
        pos = jax.lax.broadcasted_iota(jnp.int32, cv.shape, 1)
        ckey = ((_f32_to_ordered_i32(cv) & jnp.int32(~pmask))
                | (jnp.int32(pmask) - pos))
        new_v, new_i = [], []
        for _ in range(k):
            mk = jnp.max(ckey, axis=-1, keepdims=True)
            loc = jnp.int32(pmask) - (mk & jnp.int32(pmask))
            new_v.append(_ordered_i32_to_f32(mk & jnp.int32(~pmask)))
            new_i.append(jnp.sum(jnp.where(pos == loc, ci, 0),
                                 axis=-1, keepdims=True))
            ckey = jnp.where(pos == loc, jnp.int32(_I32_MIN), ckey)
        runv_sc[...] = jnp.concatenate(new_v, axis=1)
        runi_sc[...] = jnp.concatenate(new_i, axis=1)

    # ---- finalize: lane-dense (TR, 128) outputs; -lse + cum applied in XLA --
    @pl.when(v == pl.num_programs(2) - 1)
    def _finalize():
        vals_ref[...] = jnp.concatenate(
            [runv_sc[...], jnp.full((tr, 128 - k), -jnp.inf, jnp.float32)],
            axis=1)
        idx_ref[...] = jnp.concatenate(
            [runi_sc[...], jnp.zeros((tr, 128 - k), jnp.int32)], axis=1)
        lse_ref[...] = jnp.broadcast_to(m_sc[...] + jnp.log(s_sc[...]),
                                        (tr, 128))


def fused_score_topk(x, w, cum, k, *, tile_v=None, num_splits=1,
                     vocab_size=None):
    """Per-row top-k of log_softmax(x @ W) + cum, without materializing scores.

    x: (R, H) f32/bf16   w: (H, >=V) bf16 (may be pre-padded)   cum: (R, 1) f32
    Returns (vals (R, k) f32, idx (R, k) int32), sorted descending per row.
    num_splits > 1 splits the vocab across a leading "parallel" grid axis so a
    2-TC chip (v7x) can work both halves; partials are merged in XLA.
    Tie-breaks (near-equal bf16 logits) may differ from torch.topk.
    """
    R, H = x.shape
    Vw = w.shape[1]
    V = Vw if vocab_size is None else vocab_size
    assert w.shape[0] == H and 1 <= k <= 64 and V <= Vw

    if tile_v is None:
        tile_v = _pick_tile_v(H, V, num_splits)
    assert tile_v % 128 == 0 and tile_v >= 128

    TILE_R = min(_round_up(R, 8), 128)
    R_pad = _round_up(R, TILE_R)
    V_pad = _round_up(max(V, Vw), tile_v * num_splits)
    nv_per_split = V_pad // (tile_v * num_splits)

    xb = x.astype(jnp.bfloat16)
    if R_pad != R:
        xb = jnp.pad(xb, ((0, R_pad - R), (0, 0)))
    wb = w.astype(jnp.bfloat16)
    if Vw < V_pad:
        wb = jnp.pad(wb, ((0, 0), (0, V_pad - Vw)))

    kern = functools.partial(_fused_score_topk_kernel, k=k, tile_v=tile_v,
                             nv_per_split=nv_per_split, v_real=V,
                             mask_tail=(V != V_pad))
    vals_p, idx_p, lse_p = pl.pallas_call(
        kern,
        out_shape=(jax.ShapeDtypeStruct((num_splits, R_pad, 128), jnp.float32),
                   jax.ShapeDtypeStruct((num_splits, R_pad, 128), jnp.int32),
                   jax.ShapeDtypeStruct((num_splits, R_pad, 128), jnp.float32)),
        grid_spec=pltpu.PrefetchScalarGridSpec(
            num_scalar_prefetch=0,
            grid=(num_splits, R_pad // TILE_R, nv_per_split),
            in_specs=[
                pl.BlockSpec((TILE_R, H), lambda s, r, v: (r, 0)),
                pl.BlockSpec((H, tile_v),
                             lambda s, r, v: (0, s * nv_per_split + v)),
            ],
            out_specs=[
                pl.BlockSpec((None, TILE_R, 128), lambda s, r, v: (s, r, 0)),
                pl.BlockSpec((None, TILE_R, 128), lambda s, r, v: (s, r, 0)),
                pl.BlockSpec((None, TILE_R, 128), lambda s, r, v: (s, r, 0)),
            ],
            scratch_shapes=[
                pltpu.VMEM((TILE_R, 1), jnp.float32),    # running max
                pltpu.VMEM((TILE_R, 1), jnp.float32),    # running sum-exp
                pltpu.VMEM((TILE_R, k), jnp.float32),    # running top-k logits
                pltpu.VMEM((TILE_R, k), jnp.int32),      # running top-k ids
            ]),
        compiler_params=pltpu.CompilerParams(
            dimension_semantics=("parallel", "parallel", "arbitrary"),
            vmem_limit_bytes=32 * 1024 * 1024),
    )(xb, wb)

    # ---- tiny XLA epilogue: merge splits, apply -lse + cum ------------------
    lse_s = lse_p[:, :R, 0]                                   # (S, R)
    mm = jnp.max(lse_s, axis=0)
    lse = mm + jnp.log(jnp.sum(jnp.exp(lse_s - mm), axis=0))  # (R,)
    cand_v = jnp.swapaxes(vals_p[:, :R, :k], 0, 1).reshape(R, num_splits * k)
    cand_i = jnp.swapaxes(idx_p[:, :R, :k], 0, 1).reshape(R, num_splits * k)
    if num_splits == 1:
        top_v, top_i = cand_v, cand_i               # already sorted descending
    else:
        top_v, pos = jax.lax.top_k(cand_v, k)
        top_i = jnp.take_along_axis(cand_i, pos, axis=1)
    return top_v - lse[:, None] + cum, top_i


# -----------------------------------------------------------------------------
# Kernel 2: _inflate (torch.Tensor.repeat along dim 0) for 2-D tensors.
# Kept for module fidelity; not used in the decode hot loop (context is
# broadcast inside the jitted step instead).
# -----------------------------------------------------------------------------
def _inflate_kernel(x_ref, o_ref):
    o_ref[...] = x_ref[...]


def inflate_rows(x, n_repeat):
    R, C = x.shape
    out = pl.pallas_call(
        _inflate_kernel,
        out_shape=jax.ShapeDtypeStruct((n_repeat, R, C), x.dtype),
        grid_spec=pltpu.PrefetchScalarGridSpec(
            num_scalar_prefetch=0,
            grid=(n_repeat,),
            in_specs=[pl.BlockSpec((R, C), lambda r: (0, 0))],
            out_specs=pl.BlockSpec((None, R, C), lambda r: (r, 0, 0)),
        ),
    )(x)
    return out.reshape(n_repeat * R, C)   # torch.repeat(n,1): stacked copies


# -----------------------------------------------------------------------------
# Jitted beam-search decode: step 0 + lax.scan over the remaining steps.
# -----------------------------------------------------------------------------
@functools.partial(jax.jit,
                   static_argnames=("sos_id", "pad_id", "beam_size",
                                    "max_steps", "tile_v", "num_splits"))
def beam_search_decode(enc_ctx, embed, proj_w_bf16, *,
                       sos_id, pad_id, beam_size, max_steps,
                       tile_v=None, num_splits=1):
    B, H = enc_ctx.shape
    K = beam_size
    L = max_steps + 1
    V = proj_w_bf16.shape[1]

    # Pad W to the tiled vocab ONCE (outside the scan) so it is not re-padded
    # every decode step; the kernel masks columns >= V.
    if tile_v is None:
        tile_v = _pick_tile_v(H, V, num_splits)
    V_pad = _round_up(V, tile_v * num_splits)
    w_pad = proj_w_bf16.astype(jnp.bfloat16)
    if V_pad != V:
        w_pad = jnp.pad(w_pad, ((0, 0), (0, V_pad - V)))

    score = functools.partial(fused_score_topk, w=w_pad, k=K, tile_v=tile_v,
                              num_splits=num_splits, vocab_size=V)

    # ----- step 0: expand each batch item into K beams -----
    sos = jnp.full((B,), sos_id, jnp.int32)
    x0 = jnp.take(embed, sos, axis=0) + enc_ctx                     # (B, H)
    vals0, idx0 = score(x0, cum=jnp.zeros((B, 1), jnp.float32))     # (B, K)

    beams = jnp.full((B, K, L), pad_id, jnp.int32)
    beams = beams.at[:, :, 0].set(sos_id)
    beams = beams.at[:, :, 1].set(idx0)
    cum = vals0
    last = idx0

    # encoder context in (batch, beam) row order -- replaces inflate+transpose.
    ctx_bk = jnp.broadcast_to(enc_ctx[:, None, :], (B, K, H)).reshape(B * K, H)

    def step(carry, t):
        beams, cum, last = carry
        x = jnp.take(embed, last.reshape(B * K), axis=0) + ctx_bk   # (B*K, H)
        vals, idx = score(x, cum=cum.reshape(B * K, 1))             # (B*K, K)
        # Exact cross-beam merge: the per-batch top-K over K*V is contained in
        # these K*K per-beam candidates (each beam contributes its own top-K).
        cand_v = vals.reshape(B, K * K)
        cand_tok = idx.reshape(B, K * K)
        cand_beam = jnp.broadcast_to(
            jnp.arange(K, dtype=jnp.int32)[None, :, None], (B, K, K)
        ).reshape(B, K * K)
        top_v, top_pos = jax.lax.top_k(cand_v, K)                   # tiny merge
        tok = jnp.take_along_axis(cand_tok, top_pos, axis=1)
        src = jnp.take_along_axis(cand_beam, top_pos, axis=1)
        prev = jnp.take_along_axis(beams, src[:, :, None], axis=1)
        new_beams = jax.lax.dynamic_update_slice_in_dim(
            prev, tok[:, :, None], t, axis=2)
        return (new_beams, top_v, tok), None

    steps = jnp.arange(2, max_steps + 1, dtype=jnp.int32)
    (beams, cum, last), _ = jax.lax.scan(step, (beams, cum, last), steps)
    return beams, cum


# -----------------------------------------------------------------------------
# Synthetic decoder (the original takes an arbitrary decoder with sos/eos/pad
# ids and a forward_step); weights are built deterministically in-script.
# -----------------------------------------------------------------------------
class SyntheticDecoder:
    def __init__(self, embed, proj_w, sos_id=1, eos_id=2, pad_id=0):
        self.embed = embed                                  # (V, H) f32
        self.proj_w = proj_w                                # (H, V) f32
        self.proj_w_bf16 = proj_w.astype(jnp.bfloat16)      # streamed by kernel
        self.sos_id = sos_id
        self.eos_id = eos_id
        self.pad_id = pad_id

    def forward_step(self, tokens, context, cum_log_probs):
        """Reference (unfused) forward_step: full (R, V) log-prob scores."""
        x = (jnp.take(self.embed, tokens, axis=0) + context).astype(jnp.bfloat16)
        logits = jnp.dot(x, self.proj_w_bf16, preferred_element_type=jnp.float32)
        return jax.nn.log_softmax(logits, axis=-1) + cum_log_probs


# -----------------------------------------------------------------------------
# Beam-search driver mirroring OpenspeechBeamSearchBase
# -----------------------------------------------------------------------------
class OpenspeechBeamSearchPallas:
    def __init__(self, decoder, beam_size: int, batch_size: int):
        self.decoder = decoder
        self.beam_size = beam_size
        self.batch_size = batch_size
        self.sos_id = decoder.sos_id
        self.pad_id = decoder.pad_id
        self.eos_id = decoder.eos_id
        self.ongoing_beams = None        # (B, K, L) int32
        self.cumulative_ps = None        # (B, K)    float32
        self.finished = [[] for _ in range(batch_size)]
        self.finished_ps = [[] for _ in range(batch_size)]
        self.forward_step = decoder.forward_step

    def _inflate(self, tensor, n_repeat, dim):
        assert dim == 0 and tensor.ndim == 2
        return inflate_rows(tensor, n_repeat)

    def _fill_sequence(self, y_hats):
        batch_size = len(y_hats)
        max_length = max(int(y.shape[0]) for y in y_hats)
        matched = jnp.full((batch_size, max_length), self.pad_id, dtype=jnp.int32)
        for b, y in enumerate(y_hats):
            matched = matched.at[b, : y.shape[0]].set(y.astype(jnp.int32))
        return matched

    def _get_hypothesis(self):
        # TODO(synk): finished/finished_ps EOS bookkeeping (_get_successor) is
        # dynamic Python-list control flow with no clean Pallas equivalent; in
        # this synthetic run every batch falls through to the "no finished
        # beams" branch of the original _get_hypothesis.
        best = jnp.argmax(self.cumulative_ps, axis=1)                 # (B,)
        preds = jnp.take_along_axis(
            self.ongoing_beams, best[:, None, None], axis=1)[:, 0, :]  # (B, L)
        return self._fill_sequence([preds[b] for b in range(self.batch_size)])

    def _is_all_finished(self, k):
        return all(len(done) >= k for done in self.finished)

    def __call__(self, encoder_context, max_steps: int):
        beams, cum = beam_search_decode(
            encoder_context, self.decoder.embed, self.decoder.proj_w_bf16,
            sos_id=self.sos_id, pad_id=self.pad_id,
            beam_size=self.beam_size, max_steps=max_steps)
        self.ongoing_beams = beams
        self.cumulative_ps = cum
        return self._get_hypothesis()


# -----------------------------------------------------------------------------
if __name__ == "__main__":
    key = jax.random.PRNGKey(0)
    batch_size, beam_size = 2, 3
    hidden, vocab = 64, 2500          # not a multiple of 128 -> exercises pad+mask
    max_steps = 4

    k_emb, k_proj, k_enc = jax.random.split(key, 3)
    embed = 0.1 * jax.random.normal(k_emb, (vocab, hidden), jnp.float32)
    proj_w = 0.1 * jax.random.normal(k_proj, (hidden, vocab), jnp.float32)
    enc_ctx = 0.1 * jax.random.normal(k_enc, (batch_size, hidden), jnp.float32)

    decoder = SyntheticDecoder(embed, proj_w, sos_id=1, eos_id=2, pad_id=0)
    searcher = OpenspeechBeamSearchPallas(decoder, beam_size, batch_size)

    # --- fused score+top-k kernel vs. unfused reference (same bf16 inputs) ---
    # num_splits=1 is the v5e/v6e layout; num_splits=2 exercises the v7x
    # two-TensorCore vocab split (including a fully-padded trailing tile).
    R = batch_size * beam_size
    toks = (jnp.arange(R, dtype=jnp.int32) * 17) % vocab
    ctx_r = jnp.broadcast_to(enc_ctx[:, None, :],
                             (batch_size, beam_size, hidden)).reshape(R, hidden)
    cum_r = 0.5 * jax.random.normal(jax.random.PRNGKey(1), (R, 1), jnp.float32)
    x_r = jnp.take(embed, toks, axis=0) + ctx_r
    ref = decoder.forward_step(toks, ctx_r, cum_r)                   # (R, V)
    ref_top, _ = jax.lax.top_k(ref, beam_size)
    for ns in (1, 2):
        vals, idx = fused_score_topk(x_r, decoder.proj_w_bf16, cum_r, beam_size,
                                     tile_v=512, num_splits=ns)
        vals = jax.block_until_ready(vals)
        assert jnp.allclose(vals, ref_top, atol=2e-3), (
            f"fused top-k values mismatch (splits={ns})")
        picked = jnp.take_along_axis(ref, idx, axis=1)
        assert jnp.allclose(picked, vals, atol=2e-3), (
            f"fused top-k indices mismatch (splits={ns})")

    # --- _inflate (torch.Tensor.repeat) helper check ---
    infl = searcher._inflate(enc_ctx, beam_size, dim=0)
    assert jnp.array_equal(infl, jnp.tile(enc_ctx, (beam_size, 1)))

    # --- full beam-search run (single jitted scan over decode steps) ---
    preds = searcher(enc_ctx, max_steps=max_steps)
    preds = jax.block_until_ready(preds)

    assert preds.shape == (batch_size, max_steps + 1)
    assert bool(jnp.all(preds[:, 0] == decoder.sos_id))
    print("KERNEL_OK")
</pallas_src>

<mosaic_0001>
module attributes {stable_mosaic.version = 11 : i64} {
  func.func @_fused_score_topk_kernel(%arg0: i32, %arg1: i32, %arg2: i32, %arg3: memref<8x64xbf16, #tpu.memory_space<vmem>>, %arg4: memref<64x512xbf16, #tpu.memory_space<vmem>>, %arg5: memref<1x8x128xf32, #tpu.memory_space<vmem>>, %arg6: memref<1x8x128xi32, #tpu.memory_space<vmem>>, %arg7: memref<1x8x128xf32, #tpu.memory_space<vmem>>, %arg8: memref<8x1xf32, #tpu.memory_space<vmem>>, %arg9: memref<8x1xf32, #tpu.memory_space<vmem>>, %arg10: memref<8x3xf32, #tpu.memory_space<vmem>>, %arg11: memref<8x3xi32, #tpu.memory_space<vmem>>) attributes {dimension_semantics = [#tpu.dimension_semantics<parallel>, #tpu.dimension_semantics<parallel>, #tpu.dimension_semantics<arbitrary>], iteration_bounds = array<i64: 1, 1, 5>, scalar_prefetch = 0 : i64, scratch_operands = 4 : i64, tpu.core_type = #tpu.core_type<tc>, window_params = [{transform_indices = @transform_0, window_bounds = array<i64: 8, 64>}, {transform_indices = @transform_1, window_bounds = array<i64: 64, 512>}, {transform_indices = @transform_2, window_bounds = array<i64: 1, 8, 128>}, {transform_indices = @transform_3, window_bounds = array<i64: 1, 8, 128>}, {transform_indices = @transform_4, window_bounds = array<i64: 1, 8, 128>}]} {
    %c0_i32 = arith.constant 0 : i32
    %0 = arith.cmpi eq, %arg2, %c0_i32 : i32
    %1 = arith.extui %0 : i1 to i32
    %c0_i32_0 = arith.constant 0 : i32
    %2 = arith.cmpi ne, %1, %c0_i32_0 : i32
    scf.if %2 {
      %cst_23 = arith.constant 0xFF800000 : f32
      %46 = vector.broadcast %cst_23 : f32 to vector<8x1xf32>
      %c0_24 = arith.constant 0 : index
      %c0_25 = arith.constant 0 : index
      %47 = vector.load %arg8[%c0_24, %c0_25] : memref<8x1xf32, #tpu.memory_space<vmem>>, vector<8x1xf32>
      tpu.vector_store %arg8[%c0_24, %c0_25], %46 {strides = array<i32>} : memref<8x1xf32, #tpu.memory_space<vmem>>, vector<8x1xf32>,
      %cst_26 = arith.constant 0.000000e+00 : f32
      %48 = vector.broadcast %cst_26 : f32 to vector<8x1xf32>
      %c0_27 = arith.constant 0 : index
      %c0_28 = arith.constant 0 : index
      %49 = vector.load %arg9[%c0_27, %c0_28] : memref<8x1xf32, #tpu.memory_space<vmem>>, vector<8x1xf32>
      tpu.vector_store %arg9[%c0_27, %c0_28], %48 {strides = array<i32>} : memref<8x1xf32, #tpu.memory_space<vmem>>, vector<8x1xf32>,
      %cst_29 = arith.constant 0xFF800000 : f32
      %50 = vector.broadcast %cst_29 : f32 to vector<8x3xf32>
      %c0_30 = arith.constant 0 : index
      %c0_31 = arith.constant 0 : index
      %51 = vector.load %arg10[%c0_30, %c0_31] : memref<8x3xf32, #tpu.memory_space<vmem>>, vector<8x3xf32>
      tpu.vector_store %arg10[%c0_30, %c0_31], %50 {strides = array<i32>} : memref<8x3xf32, #tpu.memory_space<vmem>>, vector<8x3xf32>,
      %c0_i32_32 = arith.constant 0 : i32
      %52 = vector.broadcast %c0_i32_32 : i32 to vector<8x3xi32>
      %c0_33 = arith.constant 0 : index
      %c0_34 = arith.constant 0 : index
      %53 = vector.load %arg11[%c0_33, %c0_34] : memref<8x3xi32, #tpu.memory_space<vmem>>, vector<8x3xi32>
      tpu.vector_store %arg11[%c0_33, %c0_34], %52 {strides = array<i32>} : memref<8x3xi32, #tpu.memory_space<vmem>>, vector<8x3xi32>,
    } else {
    }
    %c0 = arith.constant 0 : index
    %c0_1 = arith.constant 0 : index
    %3 = vector.load %arg3[%c0, %c0_1] : memref<8x64xbf16, #tpu.memory_space<vmem>>, vector<8x64xbf16>
    %c0_2 = arith.constant 0 : index
    %c0_3 = arith.constant 0 : index
    %4 = vector.load %arg4[%c0_2, %c0_3] : memref<64x512xbf16, #tpu.memory_space<vmem>>, vector<64x512xbf16>
    %cst = arith.constant dense<0.000000e+00> : vector<8x512xf32>
    %5 = tpu.matmul %3, %4, %cst {dimension_numbers = #tpu.dot_dimension_numbers<[1], [0], [0], [1], [0, 0, 1, 1], [], []>} : vector<8x64xbf16>, vector<64x512xbf16>, vector<8x512xf32> -> vector<8x512xf32>
    %c5_i32 = arith.constant 5 : i32
    %6 = arith.muli %arg0, %c5_i32 : i32
    %7 = arith.addi %6, %arg2 : i32
    %c512_i32 = arith.constant 512 : i32
    %8 = arith.muli %7, %c512_i32 : i32
    %9 = tpu.iota {dimensions = array<i32: 1>} : vector<8x512xi32>
    %10 = vector.broadcast %8 : i32 to vector<8x512xi32>
    %11 = arith.addi %9, %10 : vector<8x512xi32>
    %c2500_i32 = arith.constant 2500 : i32
    %12 = vector.broadcast %c2500_i32 : i32 to vector<8x512xi32>
    %13 = arith.cmpi slt, %11, %12 : vector<8x512xi32>
    %cst_4 = arith.constant -1.000000e+30 : f32
    %14 = vector.broadcast %cst_4 : f32 to vector<8x512xf32>
    %15 = arith.select %13, %5, %14 : vector<8x512xi1>, vector<8x512xf32>
    %cst_5 = arith.constant dense<0xFF800000> : vector<8xf32>
    %16 = vector.multi_reduction <maximumf>, %15, %cst_5 [1] : vector<8x512xf32> to vector<8xf32>
    %17 = vector.shape_cast %16 : vector<8xf32> to vector<8x1xf32>
    %c0_6 = arith.constant 0 : index
    %c0_7 = arith.constant 0 : index
    %18 = vector.load %arg8[%c0_6, %c0_7] : memref<8x1xf32, #tpu.memory_space<vmem>>, vector<8x1xf32>
    %19 = arith.maximumf %18, %17 : vector<8x1xf32>
    %c0_8 = arith.constant 0 : index
    %c0_9 = arith.constant 0 : index
    %20 = vector.load %arg9[%c0_8, %c0_9] : memref<8x1xf32, #tpu.memory_space<vmem>>, vector<8x1xf32>
    %c0_10 = arith.constant 0 : index
    %c0_11 = arith.constant 0 : index
    %21 = vector.load %arg8[%c0_10, %c0_11] : memref<8x1xf32, #tpu.memory_space<vmem>>, vector<8x1xf32>
    %22 = arith.subf %21, %19 : vector<8x1xf32>
    %23 = math.exp %22 : vector<8x1xf32>
    %24 = arith.mulf %20, %23 : vector<8x1xf32>
    %25 = vector.broadcast %19 : vector<8x1xf32> to vector<8x512xf32>
    %26 = arith.subf %15, %25 : vector<8x512xf32>
    %27 = math.exp %26 : vector<8x512xf32>
    %cst_12 = arith.constant dense<0.000000e+00> : vector<8xf32>
    %28 = vector.multi_reduction <add>, %27, %cst_12 [1] : vector<8x512xf32> to vector<8xf32>
    %29 = vector.shape_cast %28 : vector<8xf32> to vector<8x1xf32>
    %30 = arith.addf %24, %29 : vector<8x1xf32>
    %c0_13 = arith.constant 0 : index
    %c0_14 = arith.constant 0 : index
    %31 = vector.load %arg9[%c0_13, %c0_14] : memref<8x1xf32, #tpu.memory_space<vmem>>, vector<8x1xf32>
    tpu.vector_store %arg9[%c0_13, %c0_14], %30 {strides = array<i32>} : memref<8x1xf32, #tpu.memory_space<vmem>>, vector<8x1xf32>,
    %c0_15 = arith.constant 0 : index
    %c0_16 = arith.constant 0 : index
    %32 = vector.load %arg8[%c0_15, %c0_16] : memref<8x1xf32, #tpu.memory_space<vmem>>, vector<8x1xf32>
    tpu.vector_store %arg8[%c0_15, %c0_16], %19 {strides = array<i32>} : memref<8x1xf32, #tpu.memory_space<vmem>>, vector<8x1xf32>,
    %c0_17 = arith.constant 0 : index
    %c0_18 = arith.constant 0 : index
    %33 = vector.load %arg10[%c0_17, %c0_18] : memref<8x3xf32, #tpu.memory_space<vmem>>, vector<8x3xf32>
    %34 = vector.extract_strided_slice %33 {offsets = [0, 2], sizes = [8, 1], strides = [1, 1]} : vector<8x3xf32> to vector<8x1xf32>
    %35 = arith.subf %17, %34 : vector<8x1xf32>
    %36 = vector.shape_cast %35 : vector<8x1xf32> to vector<1x8x1xf32>
    %cst_19 = arith.constant dense<0xFF800000> : vector<1xf32>
    %37 = vector.multi_reduction <maximumf>, %36, %cst_19 [1, 2] : vector<1x8x1xf32> to vector<1xf32>
    %38 = vector.shape_cast %37 : vector<1xf32> to vector<1x1x1xf32>
    %39 = vector.extract %38[0, 0, 0] : f32 from vector<1x1x1xf32>
    %cst_20 = arith.constant 0.000000e+00 : f32
    %40 = arith.cmpf ogt, %39, %cst_20 : f32
    %41 = arith.extui %40 : i1 to i32
    %c0_i32_21 = arith.constant 0 : i32
    %42 = arith.cmpi ne, %41, %c0_i32_21 : i32
    scf.if %42 {
      %46 = tpu.bitcast %15 : vector<8x512xf32> -> vector<8x512xi32>
      %c0_i32_23 = arith.constant 0 : i32
      %47 = vector.broadcast %c0_i32_23 : i32 to vector<8x512xi32>
      %48 = arith.cmpi sge, %46, %47 : vector<8x512xi32>
      %c-2147483648_i32 = arith.constant -2147483648 : i32
      %49 = vector.broadcast %c-2147483648_i32 : i32 to vector<8x512xi32>
      %50 = arith.subi %49, %46 : vector<8x512xi32>
      %51 = arith.select %48, %46, %50 : vector<8x512xi1>, vector<8x512xi32>
      %c-512_i32 = arith.constant -512 : i32
      %52 = vector.broadcast %c-512_i32 : i32 to vector<8x512xi32>
      %53 = arith.andi %51, %52 : vector<8x512xi32>
      %c511_i32 = arith.constant 511 : i32
      %54 = vector.broadcast %c511_i32 : i32 to vector<8x512xi32>
      %55 = arith.subi %54, %9 : vector<8x512xi32>
      %56 = arith.ori %53, %55 : vector<8x512xi32>
      %cst_24 = arith.constant dense<-2147483648> : vector<8xi32>
      %57 = vector.multi_reduction <maxsi>, %56, %cst_24 [1] : vector<8x512xi32> to vector<8xi32>
      %58 = vector.shape_cast %57 : vector<8xi32> to vector<8x1xi32>
      %c511_i32_25 = arith.constant 511 : i32
      %59 = vector.broadcast %c511_i32_25 : i32 to vector<8x1xi32>
      %60 = arith.andi %58, %59 : vector<8x1xi32>
      %c511_i32_26 = arith.constant 511 : i32
      %61 = vector.broadcast %c511_i32_26 : i32 to vector<8x1xi32>
      %62 = arith.subi %61, %60 : vector<8x1xi32>
      %c-512_i32_27 = arith.constant -512 : i32
      %63 = vector.broadcast %c-512_i32_27 : i32 to vector<8x1xi32>
      %64 = arith.andi %58, %63 : vector<8x1xi32>
      %c0_i32_28 = arith.constant 0 : i32
      %65 = vector.broadcast %c0_i32_28 : i32 to vector<8x1xi32>
      %66 = arith.cmpi sge, %64, %65 : vector<8x1xi32>
      %c-2147483648_i32_29 = arith.constant -2147483648 : i32
      %67 = vector.broadcast %c-2147483648_i32_29 : i32 to vector<8x1xi32>
      %68 = arith.subi %67, %64 : vector<8x1xi32>
      %69 = arith.select %66, %64, %68 : vector<8x1xi1>, vector<8x1xi32>
      %70 = tpu.bitcast %69 : vector<8x1xi32> -> vector<8x1xf32>
      %71 = vector.broadcast %8 : i32 to vector<8x1xi32>
      %72 = arith.addi %62, %71 : vector<8x1xi32>
      %73 = vector.broadcast %62 : vector<8x1xi32> to vector<8x512xi32>
      %74 = arith.cmpi eq, %9, %73 : vector<8x512xi32>
      %c-2147483648_i32_30 = arith.constant -2147483648 : i32
      %75 = vector.broadcast %c-2147483648_i32_30 : i32 to vector<8x512xi32>
      %76 = arith.select %74, %75, %56 : vector<8x512xi1>, vector<8x512xi32>
      %cst_31 = arith.constant dense<-2147483648> : vector<8xi32>
      %77 = vector.multi_reduction <maxsi>, %76, %cst_31 [1] : vector<8x512xi32> to vector<8xi32>
      %78 = vector.shape_cast %77 : vector<8xi32> to vector<8x1xi32>
      %c511_i32_32 = arith.constant 511 : i32
      %79 = vector.broadcast %c511_i32_32 : i32 to vector<8x1xi32>
      %80 = arith.andi %78, %79 : vector<8x1xi32>
      %c511_i32_33 = arith.constant 511 : i32
      %81 = vector.broadcast %c511_i32_33 : i32 to vector<8x1xi32>
      %82 = arith.subi %81, %80 : vector<8x1xi32>
      %c-512_i32_34 = arith.constant -512 : i32
      %83 = vector.broadcast %c-512_i32_34 : i32 to vector<8x1xi32>
      %84 = arith.andi %78, %83 : vector<8x1xi32>
      %c0_i32_35 = arith.constant 0 : i32
      %85 = vector.broadcast %c0_i32_35 : i32 to vector<8x1xi32>
      %86 = arith.cmpi sge, %84, %85 : vector<8x1xi32>
      %c-2147483648_i32_36 = arith.constant -2147483648 : i32
      %87 = vector.broadcast %c-2147483648_i32_36 : i32 to vector<8x1xi32>
      %88 = arith.subi %87, %84 : vector<8x1xi32>
      %89 = arith.select %86, %84, %88 : vector<8x1xi1>, vector<8x1xi32>
      %90 = tpu.bitcast %89 : vector<8x1xi32> -> vector<8x1xf32>
      %91 = vector.broadcast %8 : i32 to vector<8x1xi32>
      %92 = arith.addi %82, %91 : vector<8x1xi32>
      %93 = vector.broadcast %82 : vector<8x1xi32> to vector<8x512xi32>
      %94 = arith.cmpi eq, %9, %93 : vector<8x512xi32>
      %c-2147483648_i32_37 = arith.constant -2147483648 : i32
      %95 = vector.broadcast %c-2147483648_i32_37 : i32 to vector<8x512xi32>
      %96 = arith.select %94, %95, %76 : vector<8x512xi1>, vector<8x512xi32>
      %cst_38 = arith.constant dense<-2147483648> : vector<8xi32>
      %97 = vector.multi_reduction <maxsi>, %96, %cst_38 [1] : vector<8x512xi32> to vector<8xi32>
      %98 = vector.shape_cast %97 : vector<8xi32> to vector<8x1xi32>
      %c511_i32_39 = arith.constant 511 : i32
      %99 = vector.broadcast %c511_i32_39 : i32 to vector<8x1xi32>
      %100 = arith.andi %98, %99 : vector<8x1xi32>
      %c511_i32_40 = arith.constant 511 : i32
      %101 = vector.broadcast %c511_i32_40 : i32 to vector<8x1xi32>
      %102 = arith.subi %101, %100 : vector<8x1xi32>
      %c-512_i32_41 = arith.constant -512 : i32
      %103 = vector.broadcast %c-512_i32_41 : i32 to vector<8x1xi32>
      %104 = arith.andi %98, %103 : vector<8x1xi32>
      %c0_i32_42 = arith.constant 0 : i32
      %105 = vector.broadcast %c0_i32_42 : i32 to vector<8x1xi32>
      %106 = arith.cmpi sge, %104, %105 : vector<8x1xi32>
      %c-2147483648_i32_43 = arith.constant -2147483648 : i32
      %107 = vector.broadcast %c-2147483648_i32_43 : i32 to vector<8x1xi32>
      %108 = arith.subi %107, %104 : vector<8x1xi32>
      %109 = arith.select %106, %104, %108 : vector<8x1xi1>, vector<8x1xi32>
      %110 = tpu.bitcast %109 : vector<8x1xi32> -> vector<8x1xf32>
      %111 = vector.broadcast %8 : i32 to vector<8x1xi32>
      %112 = arith.addi %102, %111 : vector<8x1xi32>
      %c0_44 = arith.constant 0 : index
      %c0_45 = arith.constant 0 : index
      %113 = vector.load %arg10[%c0_44, %c0_45] : memref<8x3xf32, #tpu.memory_space<vmem>>, vector<8x3xf32>
      %114 = tpu.concatenate %113, %70, %90, %110 in 1 : vector<8x3xf32>, vector<8x1xf32>, vector<8x1xf32>, vector<8x1xf32> -> vector<8x6xf32>
      %c0_46 = arith.constant 0 : index
      %c0_47 = arith.constant 0 : index
      %115 = vector.load %arg11[%c0_46, %c0_47] : memref<8x3xi32, #tpu.memory_space<vmem>>, vector<8x3xi32>
      %116 = tpu.concatenate %115, %72, %92, %112 in 1 : vector<8x3xi32>, vector<8x1xi32>, vector<8x1xi32>, vector<8x1xi32> -> vector<8x6xi32>
      %117 = tpu.iota {dimensions = array<i32: 1>} : vector<8x6xi32>
      %118 = tpu.bitcast %114 : vector<8x6xf32> -> vector<8x6xi32>
      %c0_i32_48 = arith.constant 0 : i32
      %119 = vector.broadcast %c0_i32_48 : i32 to vector<8x6xi32>
      %120 = arith.cmpi sge, %118, %119 : vector<8x6xi32>
      %c-2147483648_i32_49 = arith.constant -2147483648 : i32
      %121 = vector.broadcast %c-2147483648_i32_49 : i32 to vector<8x6xi32>
      %122 = arith.subi %121, %118 : vector<8x6xi32>
      %123 = arith.select %120, %118, %122 : vector<8x6xi1>, vector<8x6xi32>
      %c-8_i32 = arith.constant -8 : i32
      %124 = vector.broadcast %c-8_i32 : i32 to vector<8x6xi32>
      %125 = arith.andi %123, %124 : vector<8x6xi32>
      %c7_i32 = arith.constant 7 : i32
      %126 = vector.broadcast %c7_i32 : i32 to vector<8x6xi32>
      %127 = arith.subi %126, %117 : vector<8x6xi32>
      %128 = arith.ori %125, %127 : vector<8x6xi32>
      %cst_50 = arith.constant dense<-2147483648> : vector<8xi32>
      %129 = vector.multi_reduction <maxsi>, %128, %cst_50 [1] : vector<8x6xi32> to vector<8xi32>
      %130 = vector.shape_cast %129 : vector<8xi32> to vector<8x1xi32>
      %c7_i32_51 = arith.constant 7 : i32
      %131 = vector.broadcast %c7_i32_51 : i32 to vector<8x1xi32>
      %132 = arith.andi %130, %131 : vector<8x1xi32>
      %c7_i32_52 = arith.constant 7 : i32
      %133 = vector.broadcast %c7_i32_52 : i32 to vector<8x1xi32>
      %134 = arith.subi %133, %132 : vector<8x1xi32>
      %c-8_i32_53 = arith.constant -8 : i32
      %135 = vector.broadcast %c-8_i32_53 : i32 to vector<8x1xi32>
      %136 = arith.andi %130, %135 : vector<8x1xi32>
      %c0_i32_54 = arith.constant 0 : i32
      %137 = vector.broadcast %c0_i32_54 : i32 to vector<8x1xi32>
      %138 = arith.cmpi sge, %136, %137 : vector<8x1xi32>
      %c-2147483648_i32_55 = arith.constant -2147483648 : i32
      %139 = vector.broadcast %c-2147483648_i32_55 : i32 to vector<8x1xi32>
      %140 = arith.subi %139, %136 : vector<8x1xi32>
      %141 = arith.select %138, %136, %140 : vector<8x1xi1>, vector<8x1xi32>
      %142 = tpu.bitcast %141 : vector<8x1xi32> -> vector<8x1xf32>
      %143 = vector.broadcast %134 : vector<8x1xi32> to vector<8x6xi32>
      %144 = arith.cmpi eq, %117, %143 : vector<8x6xi32>
      %c0_i32_56 = arith.constant 0 : i32
      %145 = vector.broadcast %c0_i32_56 : i32 to vector<8x6xi32>
      %146 = arith.select %144, %116, %145 : vector<8x6xi1>, vector<8x6xi32>
      %cst_57 = arith.constant dense<0> : vector<8xi32>
      %147 = vector.multi_reduction <add>, %146, %cst_57 [1] : vector<8x6xi32> to vector<8xi32>
      %148 = vector.shape_cast %147 : vector<8xi32> to vector<8x1xi32>
      %149 = vector.broadcast %134 : vector<8x1xi32> to vector<8x6xi32>
      %150 = arith.cmpi eq, %117, %149 : vector<8x6xi32>
      %c-2147483648_i32_58 = arith.constant -2147483648 : i32
      %151 = vector.broadcast %c-2147483648_i32_58 : i32 to vector<8x6xi32>
      %152 = arith.select %150, %151, %128 : vector<8x6xi1>, vector<8x6xi32>
      %cst_59 = arith.constant dense<-2147483648> : vector<8xi32>
      %153 = vector.multi_reduction <maxsi>, %152, %cst_59 [1] : vector<8x6xi32> to vector<8xi32>
      %154 = vector.shape_cast %153 : vector<8xi32> to vector<8x1xi32>
      %c7_i32_60 = arith.constant 7 : i32
      %155 = vector.broadcast %c7_i32_60 : i32 to vector<8x1xi32>
      %156 = arith.andi %154, %155 : vector<8x1xi32>
      %c7_i32_61 = arith.constant 7 : i32
      %157 = vector.broadcast %c7_i32_61 : i32 to vector<8x1xi32>
      %158 = arith.subi %157, %156 : vector<8x1xi32>
      %c-8_i32_62 = arith.constant -8 : i32
      %159 = vector.broadcast %c-8_i32_62 : i32 to vector<8x1xi32>
      %160 = arith.andi %154, %159 : vector<8x1xi32>
      %c0_i32_63 = arith.constant 0 : i32
      %161 = vector.broadcast %c0_i32_63 : i32 to vector<8x1xi32>
      %162 = arith.cmpi sge, %160, %161 : vector<8x1xi32>
      %c-2147483648_i32_64 = arith.constant -2147483648 : i32
      %163 = vector.broadcast %c-2147483648_i32_64 : i32 to vector<8x1xi32>
      %164 = arith.subi %163, %160 : vector<8x1xi32>
      %165 = arith.select %162, %160, %164 : vector<8x1xi1>, vector<8x1xi32>
      %166 = tpu.bitcast %165 : vector<8x1xi32> -> vector<8x1xf32>
      %167 = vector.broadcast %158 : vector<8x1xi32> to vector<8x6xi32>
      %168 = arith.cmpi eq, %117, %167 : vector<8x6xi32>
      %c0_i32_65 = arith.constant 0 : i32
      %169 = vector.broadcast %c0_i32_65 : i32 to vector<8x6xi32>
      %170 = arith.select %168, %116, %169 : vector<8x6xi1>, vector<8x6xi32>
      %cst_66 = arith.constant dense<0> : vector<8xi32>
      %171 = vector.multi_reduction <add>, %170, %cst_66 [1] : vector<8x6xi32> to vector<8xi32>
      %172 = vector.shape_cast %171 : vector<8xi32> to vector<8x1xi32>
      %173 = vector.broadcast %158 : vector<8x1xi32> to vector<8x6xi32>
      %174 = arith.cmpi eq, %117, %173 : vector<8x6xi32>
      %c-2147483648_i32_67 = arith.constant -2147483648 : i32
      %175 = vector.broadcast %c-2147483648_i32_67 : i32 to vector<8x6xi32>
      %176 = arith.select %174, %175, %152 : vector<8x6xi1>, vector<8x6xi32>
      %cst_68 = arith.constant dense<-2147483648> : vector<8xi32>
      %177 = vector.multi_reduction <maxsi>, %176, %cst_68 [1] : vector<8x6xi32> to vector<8xi32>
      %178 = vector.shape_cast %177 : vector<8xi32> to vector<8x1xi32>
      %c7_i32_69 = arith.constant 7 : i32
      %179 = vector.broadcast %c7_i32_69 : i32 to vector<8x1xi32>
      %180 = arith.andi %178, %179 : vector<8x1xi32>
      %c7_i32_70 = arith.constant 7 : i32
      %181 = vector.broadcast %c7_i32_70 : i32 to vector<8x1xi32>
      %182 = arith.subi %181, %180 : vector<8x1xi32>
      %c-8_i32_71 = arith.constant -8 : i32
      %183 = vector.broadcast %c-8_i32_71 : i32 to vector<8x1xi32>
      %184 = arith.andi %178, %183 : vector<8x1xi32>
      %c0_i32_72 = arith.constant 0 : i32
      %185 = vector.broadcast %c0_i32_72 : i32 to vector<8x1xi32>
      %186 = arith.cmpi sge, %184, %185 : vector<8x1xi32>
      %c-2147483648_i32_73 = arith.constant -2147483648 : i32
      %187 = vector.broadcast %c-2147483648_i32_73 : i32 to vector<8x1xi32>
      %188 = arith.subi %187, %184 : vector<8x1xi32>
      %189 = arith.select %186, %184, %188 : vector<8x1xi1>, vector<8x1xi32>
      %190 = tpu.bitcast %189 : vector<8x1xi32> -> vector<8x1xf32>
      %191 = vector.broadcast %182 : vector<8x1xi32> to vector<8x6xi32>
      %192 = arith.cmpi eq, %117, %191 : vector<8x6xi32>
      %c0_i32_74 = arith.constant 0 : i32
      %193 = vector.broadcast %c0_i32_74 : i32 to vector<8x6xi32>
      %194 = arith.select %192, %116, %193 : vector<8x6xi1>, vector<8x6xi32>
      %cst_75 = arith.constant dense<0> : vector<8xi32>
      %195 = vector.multi_reduction <add>, %194, %cst_75 [1] : vector<8x6xi32> to vector<8xi32>
      %196 = vector.shape_cast %195 : vector<8xi32> to vector<8x1xi32>
      %197 = tpu.concatenate %142, %166, %190 in 1 : vector<8x1xf32>, vector<8x1xf32>, vector<8x1xf32> -> vector<8x3xf32>
      %c0_76 = arith.constant 0 : index
      %c0_77 = arith.constant 0 : index
      %198 = vector.load %arg10[%c0_76, %c0_77] : memref<8x3xf32, #tpu.memory_space<vmem>>, vector<8x3xf32>
      tpu.vector_store %arg10[%c0_76, %c0_77], %197 {strides = array<i32>} : memref<8x3xf32, #tpu.memory_space<vmem>>, vector<8x3xf32>,
      %199 = tpu.concatenate %148, %172, %196 in 1 : vector<8x1xi32>, vector<8x1xi32>, vector<8x1xi32> -> vector<8x3xi32>
      %c0_78 = arith.constant 0 : index
      %c0_79 = arith.constant 0 : index
      %200 = vector.load %arg11[%c0_78, %c0_79] : memref<8x3xi32, #tpu.memory_space<vmem>>, vector<8x3xi32>
      tpu.vector_store %arg11[%c0_78, %c0_79], %199 {strides = array<i32>} : memref<8x3xi32, #tpu.memory_space<vmem>>, vector<8x3xi32>,
    } else {
    }
    %c4_i32 = arith.constant 4 : i32
    %43 = arith.cmpi eq, %arg2, %c4_i32 : i32
    %44 = arith.extui %43 : i1 to i32
    %c0_i32_22 = arith.constant 0 : i32
    %45 = arith.cmpi ne, %44, %c0_i32_22 : i32
    scf.if %45 {
      %c0_23 = arith.constant 0 : index
      %c0_24 = arith.constant 0 : index
      %46 = vector.load %arg10[%c0_23, %c0_24] : memref<8x3xf32, #tpu.memory_space<vmem>>, vector<8x3xf32>
      %cst_25 = arith.constant 0xFF800000 : f32
      %47 = vector.broadcast %cst_25 : f32 to vector<8x125xf32>
      %48 = tpu.concatenate %46, %47 in 1 : vector<8x3xf32>, vector<8x125xf32> -> vector<8x128xf32>
      %c0_26 = arith.constant 0 : index
      %c0_27 = arith.constant 0 : index
      %c0_28 = arith.constant 0 : index
      %49 = vector.load %arg5[%c0_26, %c0_27, %c0_28] : memref<1x8x128xf32, #tpu.memory_space<vmem>>, vector<1x8x128xf32>
      %50 = vector.shape_cast %49 : vector<1x8x128xf32> to vector<8x128xf32>
      %51 = vector.shape_cast %48 : vector<8x128xf32> to vector<1x8x128xf32>
      tpu.vector_store %arg5[%c0_26, %c0_27, %c0_28], %51 {strides = array<i32>} : memref<1x8x128xf32, #tpu.memory_space<vmem>>, vector<1x8x128xf32>,
      %c0_29 = arith.constant 0 : index
      %c0_30 = arith.constant 0 : index
      %52 = vector.load %arg11[%c0_29, %c0_30] : memref<8x3xi32, #tpu.memory_space<vmem>>, vector<8x3xi32>
      %c0_i32_31 = arith.constant 0 : i32
      %53 = vector.broadcast %c0_i32_31 : i32 to vector<8x125xi32>
      %54 = tpu.concatenate %52, %53 in 1 : vector<8x3xi32>, vector<8x125xi32> -> vector<8x128xi32>
      %c0_32 = arith.constant 0 : index
      %c0_33 = arith.constant 0 : index
      %c0_34 = arith.constant 0 : index
      %55 = vector.load %arg6[%c0_32, %c0_33, %c0_34] : memref<1x8x128xi32, #tpu.memory_space<vmem>>, vector<1x8x128xi32>
      %56 = vector.shape_cast %55 : vector<1x8x128xi32> to vector<8x128xi32>
      %57 = vector.shape_cast %54 : vector<8x128xi32> to vector<1x8x128xi32>
      tpu.vector_store %arg6[%c0_32, %c0_33, %c0_34], %57 {strides = array<i32>} : memref<1x8x128xi32, #tpu.memory_space<vmem>>, vector<1x8x128xi32>,
      %c0_35 = arith.constant 0 : index
      %c0_36 = arith.constant 0 : index
      %58 = vector.load %arg8[%c0_35, %c0_36] : memref<8x1xf32, #tpu.memory_space<vmem>>, vector<8x1xf32>
      %c0_37 = arith.constant 0 : index
      %c0_38 = arith.constant 0 : index
      %59 = vector.load %arg9[%c0_37, %c0_38] : memref<8x1xf32, #tpu.memory_space<vmem>>, vector<8x1xf32>
      %60 = math.log %59 : vector<8x1xf32>
      %61 = arith.addf %58, %60 : vector<8x1xf32>
      %62 = vector.shape_cast %61 : vector<8x1xf32> to vector<8x1xf32>
      %63 = vector.broadcast %62 : vector<8x1xf32> to vector<8x128xf32>
      %c0_39 = arith.constant 0 : index
      %c0_40 = arith.constant 0 : index
      %c0_41 = arith.constant 0 : index
      %64 = vector.load %arg7[%c0_39, %c0_40, %c0_41] : memref<1x8x128xf32, #tpu.memory_space<vmem>>, vector<1x8x128xf32>
      %65 = vector.shape_cast %64 : vector<1x8x128xf32> to vector<8x128xf32>
      %66 = vector.shape_cast %63 : vector<8x128xf32> to vector<1x8x128xf32>
      tpu.vector_store %arg7[%c0_39, %c0_40, %c0_41], %66 {strides = array<i32>} : memref<1x8x128xf32, #tpu.memory_space<vmem>>, vector<1x8x128xf32>,
    } else {
    }
    return
  }
  func.func @transform_0(%arg0: i32, %arg1: i32, %arg2: i32) -> (i32, i32) {
    %c0_i32 = arith.constant 0 : i32
    %c0_i32_0 = arith.constant 0 : i32
    return %arg1, %c0_i32 : i32, i32
  }
  func.func @transform_1(%arg0: i32, %arg1: i32, %arg2: i32) -> (i32, i32) {
    %c5_i32 = arith.constant 5 : i32
    %0 = arith.muli %arg0, %c5_i32 : i32
    %1 = arith.addi %0, %arg2 : i32
    %c0_i32 = arith.constant 0 : i32
    %c0_i32_0 = arith.constant 0 : i32
    return %c0_i32, %1 : i32, i32
  }
  func.func @transform_2(%arg0: i32, %arg1: i32, %arg2: i32) -> (i32, i32, i32) {
    %c0_i32 = arith.constant 0 : i32
    %c0_i32_0 = arith.constant 0 : i32
    return %arg0, %arg1, %c0_i32 : i32, i32, i32
  }
  func.func @transform_3(%arg0: i32, %arg1: i32, %arg2: i32) -> (i32, i32, i32) {
    %c0_i32 = arith.constant 0 : i32
    %c0_i32_0 = arith.constant 0 : i32
    return %arg0, %arg1, %c0_i32 : i32, i32, i32
  }
  func.func @transform_4(%arg0: i32, %arg1: i32, %arg2: i32) -> (i32, i32, i32) {
    %c0_i32 = arith.constant 0 : i32
    %c0_i32_0 = arith.constant 0 : i32
    return %arg0, %arg1, %c0_i32 : i32, i32, i32
  }
}

</mosaic_0001>

<bundles_post_ra>
// kernel: tpu_custom_call.1
= control target key start
LH: loop header
LB: loop body
LE: loop exit
PB: predicated region body
PF: predicated region fallthrough
CT: control target
= control target key end

     0   :  { %10 = vsyncpa [#allocation7], 0  ;;  %s1640_s0 = inlined_call_operand.hbm [shape: bf16[8,64], index: 0, kind: input, shape index: {}]   ;;  %s1641_s1 = inlined_call_operand.hbm [shape: bf16[64,2560], index: 1, kind: input, shape index: {}]   ;;  %s1642_s2 = inlined_call_operand.hbm [shape: f32[1,8,128], index: 2, kind: output, shape index: {0}]   ;;  %s1643_s3 = inlined_call_operand.hbm [shape: s32[1,8,128], index: 3, kind: output, shape index: {1}]   ;;  %s1644_s4 = inlined_call_operand.hbm [shape: f32[1,8,128], index: 4, kind: output, shape index: {2}]  }
   0x1   :  { %11 = vsyncpa [#allocation10], 0 }
   0x2   :  { %13 = vsyncpa [#allocation10 + $0x1], 0 }
   0x3   :  { %14 = vsyncpa [#allocation8], 0 }
   0x4   :  { %15 = vsyncpa [#allocation13], 0  ;;  %s1377_s15 = smov 0   ;;  %s1379_s16 = smov 0  }
   0x5   :  { %s1381_s17 = smov 0   ;;  %s1383_s18 = smov 0  }
   0x6   :  { %s1385_s19 = smov 0   ;;  %s1387_s20 = smov 0  }
   0x7 LB: > { %s974_s21 = sadd.s32 4294967295, %s1337_s20   ;;  %s77_s22 = sadd.s32 1, %s1325_s17  ;;  %s1337_s20 = sphi %s1387_s20, %s21_s20   ;;  %s1333_s19 = sphi %s1385_s19, %s1658_s19   ;;  %s1329_s18 = sphi %s1383_s18, %s1657_s18   ;;  %s1325_s17 = sphi %s1381_s17, %s1656_s17   ;;  %s1321_s16 = sphi %s1379_s16, %s1655_s16   ;;  %s1317_s15 = sphi %s1377_s15, %s1654_s15  }
   0x8   : > { %p84_p0 = scmp.ne.s32.totalorder %s1325_s17, %s1321_s16  ;;  %p85_p1 = scmp.eq.s32.totalorder %s1337_s20, 0 }
   0x9   : > { %p90_p2 = scmp.ne.s32.totalorder %s1321_s16, %s1317_s15  ;;  %p1413_p3 = scmp.eq.s32.totalorder %s974_s21, 0 }
   0xa   : > { %p86_p4 = por %p85_p1, %p84_p0  ;;  %p975_p5 = scmp.ge.s32.totalorder %s1337_s20, 1 }
   0xb   : > { %p1420_p6 = por %p1413_p3, %p90_p2  ;;  %p185_p7 = scmp.lt.s32.totalorder %s1337_s20, 6 }
   0xc   : > { %s1339_s26 = smov [#allocation6]   ;;  %p1043_p10 = scmp.lt.s32.totalorder %s1337_s20, 5 }
   0xd   : > { %s1648_s24 = scalar_select %p1420_p6, 1, 0 }
   0xe   : > { %p1425_p8 = pnand %p975_p5, %p185_p7  ;;  %s200_s27 = sshll.u32 %s1339_s26, 4  ;;  %s201_s27 = int_to_ptr.vmem [resolvable:$true] %s200_s27 }
   0xf   : > { %s211_s28 = sand.u32 1, %s1325_s17   ;;  %p1435_p12 = pnand %p1043_p10, %p86_p4 }
  0x10   : > { %s1649_s25 = scalar_select %p1425_p8, 1, 0 }
  0x11   : > { %p1034_p9 = pneg %p1425_p8  ;;  %s1160_s30 = scalar_lea.vmem %s201_s27, 64 }
  0x12   : > { %p1161_p0 = scmp.ne.s32.totalorder %s201_s27, %s1160_s30  ;;  %p1168_p5 = scmp.lt.s32.totalorder %s201_s27, %s201_s27 }
  0x13   : > { %p1035_p11 = pnand %p1034_p9, %p1413_p3  ;;  %p1169_p7 = scmp.lt.s32.totalorder %s1160_s30, %s1160_s30 }
  0x15   : > { %p1151_p13 = pneg %p1035_p11  ;;  %p1170_p6 = por %p1169_p7, %p1168_p5 }
  0x17   : > { %p1163_p1 = pnand %p1161_p0, %p1151_p13 }
  0x19   : > { %p1164_p2 = pneg %p1163_p1 }
  0x1b   : > { %p1171_p8 = pnand %p1170_p6, %p1164_p2 }
  0x1d   : > { %1174 = shalt.err (!%p1171_p8)
}
  0x1e   : > { %1037 = dma.hbm_to_vmem [thread:$0]  (!%p1035_p11), %s1640_s0, 64, %s201_s27, [#allocation7]  }
  0x1f   : > { %s33_s7 = sadd.s32 1, %s1333_s19  ;;  %s978_s8 = sshll.u32 %s211_s28, 7 }
  0x20   : > { %p34_p4 = scmp.ge.s32.totalorder %s33_s7, 5  ;;  %s1013_s9 = sshll.u32 %s1333_s19, 8 }
  0x21   : > { %s215_s10 = scalar_lea.vmem [#allocation9], %s978_s8  ;;  %s223_s14 = scalar_lea.hbm %s1641_s1, %s1013_s9 }
  0x22   : > { %s224_s11 = sshll.u32 %s215_s10, 4  ;;  %s1660_s7 = smov (%p34_p4, %s33_s7), 0  ;;  %s225_s11 = int_to_ptr.vmem [resolvable:$true] %s224_s11 }
  0x23   : > { %s74_s15 = ssub.s32 %s1333_s19, %s1660_s7  ;;  %s212_s27 = scalar_lea.sflag [#allocation10], %s211_s28 }
  0x24   : > { %p75_p6 = scmp.eq.s32.totalorder %s74_s15, 0  ;;  %p1177_p8 = pneg %p1435_p12 }
  0x25   : > { %s1188_s30 = scalar_lea.vmem %s225_s11, 2048  ;;  %s1340_s5 = smov [#allocation9]  }
  0x26   : > { %s1454_s26 = scalar_select %p75_p6, %s1325_s17, %s77_s22  }
  0x27   : > { %p1189_p9 = scmp.ne.s32.totalorder %s225_s11, %s1188_s30  ;;  %s1193_s6 = sshll.u32 %s1340_s5, 4  ;;  %s1194_s6 = int_to_ptr.vmem [resolvable:$false] %s1193_s6 }
  0x28   : > { %s1195_s8 = scalar_lea.vmem %s1194_s6, 4096  ;;  %p1196_p13 = scmp.lt.s32.totalorder %s225_s11, %s1194_s6 }
  0x29   : > { %p1191_p10 = pnand %p1189_p9, %p1177_p8  ;;  %p1197_p0 = scmp.lt.s32.totalorder %s1195_s8, %s1188_s30 }
  0x2b   : > { %p1192_p11 = pneg %p1191_p10  ;;  %p1198_p1 = por %p1197_p0, %p1196_p13 }
  0x2d   : > { %p1199_p2 = pnand %p1198_p1, %p1192_p11 }
  0x2f   : > { %1202 = shalt.err (!%p1199_p2)
}
  0x30   : > { %s1341_s9 = smov 1280   ;;  %s1342_s22 = smov 256  }
  0x31   : > { %s1343_s10 = smov 16   ;;  %p1651_p5 = scmp.ne.s32.totalorder %s1649_s25, 0 }
  0x32   : > { %1041 = dma.hbm_to_vmem [thread:$0]  (!%p1435_p12), %s223_s14, 2048, %s225_s11, %s212_s27, %s1341_s9, %s1342_s22, %s1343_s10  }
  0x33   : > { %236 = sbr.rel (%p1651_p5) target bundleno = 2761 (0xac9), region = 28 }
  0x38   : > { %1300 = dma.done.wait (%p1413_p3), [#allocation7], 64  }
  0x39   : > { %1302 = vsyncadd (%p1413_p3), [#allocation7], 4294967232  ;;  %s242_s28 = sand.u32 1, %s1321_s16   ;;  %p1652_p7 = scmp.ne.s32.totalorder %s1648_s24, 0 }
  0x3a   : > { %s983_s12 = sshll.u32 %s242_s28, 7  ;;  %s243_s13 = scalar_lea.sflag [#allocation10], %s242_s28 }
  0x3b   : > { %s1467_s15 = scalar_lea.vmem [#allocation9], %s983_s12 }
  0x3c   : > { %1304 = dma.done.wait (%p1652_p7), %s243_s13, 2048  }
  0x3d   : > { %1306 = vsyncadd (%p1652_p7), %s243_s13, 4294965248  ;;  %p984_p12 = scmp.ne.s32.totalorder %s1329_s18, 0 }
  0x3f   : > { %273 = sbr.rel (%p984_p12) target bundleno = 71 (0x47), region = 40 }
  0x44   : > { %vm274_vm0 = vcmask 7168   ;;  %vm277_vm1 = vcmask 23552   ;;  %v1344_v0 = vmov -inf   ;;  %v1345_v1 = vmov 0.0  }
  0x45   : > { %275 = vst.msk [vmem:[#allocation2] sm:$0xff] %vm274_vm0, %v1344_v0  ;;  %276 = vst.msk [vmem:[#allocation3] sm:$0xff] %vm274_vm0, %v1345_v1  ;;  %v1346_v2 = vmov 0  }
  0x46   : > { %278 = vst.msk [vmem:[#allocation4] sm:$0xff] %vm277_vm1, %v1344_v0  ;;  %279 = vst.msk [vmem:[#allocation5] sm:$0xff] %vm277_vm1, %v1346_v2 }
  0x47 PF: > { %v1112_v3 = vld [vmem:[%s1467_s15 + $0x64] ss:$16 sps:$4 sm:$0xff]   ;;  %v1114_v4 = vld [vmem:[%s1467_s15 + $0x6c] ss:$16 sps:$4 sm:$0xff]   ;;  %v1347_v5 = vmov 0   ;;  %vm377_vm2 = vcmask 523264   ;;  %v466_v21 = vlaneseq }
  0x48   : > { %413 = vmatprep.mubr.bf16.mxu0 %v1347_v5  ;;  %454 = vmatprep.mubr.bf16.mxu1 %v1347_v5  ;;  %v1116_v6 = vld [vmem:[%s1467_s15 + $0x60] ss:$16 sps:$4 sm:$0xff]   ;;  %v1117_v7 = vld [vmem:[%s1467_s15 + $0x68] ss:$16 sps:$4 sm:$0xff]   ;;  %v1118_v8 = vld [vmem:[%s1467_s15 + $0x44] ss:$16 sps:$4 sm:$0xff]  }
  0x49   : > { %389 = vmatprep.subr.bf16.mxu0 %v1112_v3  ;;  %1111 = vset.pattern.permute.xlu0 %v1347_v5  ;;  %v1120_v9 = vld [vmem:[%s1467_s15 + $0x4c] ss:$16 sps:$4 sm:$0xff]   ;;  %v1122_v10 = vld [vmem:[%s1467_s15 + $0x40] ss:$16 sps:$4 sm:$0xff]   ;;  %v1123_v11 = vld [vmem:[%s1467_s15 + $0x48] ss:$16 sps:$4 sm:$0xff]  }
  0x4a   : > { %430 = vmatprep.subr.bf16.mxu1 %v1114_v4  ;;  %390 = vmatpush1.bf16.msra.mxu0 %v1116_v6  ;;  %v1124_v12 = vld [vmem:[%s1467_s15 + $0x24] ss:$16 sps:$4 sm:$0xff]   ;;  %v1126_v13 = vld [vmem:[%s1467_s15 + $0x2c] ss:$16 sps:$4 sm:$0xff]   ;;  %v1128_v14 = vld [vmem:[%s1467_s15 + $0x20] ss:$16 sps:$4 sm:$0xff]  }
  0x4b   : > { %431 = vmatpush1.bf16.msra.mxu1 %v1117_v7  ;;  %391 = vmatprep.subr.bf16.mxu0 %v1118_v8  ;;  %v1129_v15 = vld [vmem:[%s1467_s15 + $0x28] ss:$16 sps:$4 sm:$0xff]   ;;  %v1130_v16 = vld [vmem:[%s1467_s15 + $0x4] ss:$16 sps:$4 sm:$0xff]   ;;  %v1132_v17 = vld [vmem:[%s1467_s15 + $0xc] ss:$16 sps:$4 sm:$0xff]  }
  0x4c   : > { %432 = vmatprep.subr.bf16.mxu1 %v1120_v9  ;;  %v1134_v18 = vld [vmem:[%s1467_s15] ss:$16 sps:$4 sm:$0xff]   ;;  %v1135_v19 = vld [vmem:[%s1467_s15 + $0x8] ss:$16 sps:$4 sm:$0xff]   ;;  %v280_v20 = vld [vmem:[#allocation6] sm:$0xf] }
  0x4d   : > { %v1490_v22 = vand.u32 127, %v466_v21  ;;  %s1003_s23 = sshll.u32 %s1329_s18, 9  ;;  %v489_v46 = vld [vmem:[#allocation2] sm:$0xff]  ;;  %v522_v47 = vld [vmem:[#allocation4] sm:$0xff]  ;;  %vm519_vm7 = vcmask 7168   ;;  %vm524_vm8 = vcmask 23568  }
  0x4e   : > { %392 = vmatpush1.bf16.msra.mxu0 %v1122_v10  ;;  %v1493_v23 = vstv %s1003_s23 }
  0x4f   : > { %433 = vmatpush1.bf16.msra.mxu1 %v1123_v11  ;;  %393 = vmatprep.subr.bf16.mxu0 %v1124_v12  ;;  %v1496_v24 = vadd.s32 256, %v1490_v22  ;;  %v1499_v25 = vadd.s32 128, %v1490_v22  ;;  %v1502_v26 = vadd.s32 384, %v1490_v22  ;;  %v472_v27 = vadd.s32 %v1493_v23, %v1490_v22 }
  0x50   : > { %434 = vmatprep.subr.bf16.mxu1 %v1126_v13 }
  0x51   : > { %v474_v28 = vadd.s32 %v1493_v23, %v1496_v24  ;;  %v473_v29 = vadd.s32 %v1493_v23, %v1499_v25  ;;  %v475_v30 = vadd.s32 %v1493_v23, %v1502_v26  ;;  %vm476_vm3 = vcmp.lt.s32.totalorder %v472_v27, 2500 }
  0x52   : > { %394 = vmatpush1.bf16.msra.mxu0 %v1128_v14  ;;  %v491_v14 = vld [vmem:[#allocation3] sm:$0xff] }
  0x53   : > { %435 = vmatpush1.bf16.msra.mxu1 %v1129_v15  ;;  %395 = vmatprep.subr.bf16.mxu0 %v1130_v16  ;;  %vm478_vm4 = vcmp.lt.s32.totalorder %v474_v28, 2500  ;;  %vm477_vm5 = vcmp.lt.s32.totalorder %v473_v29, 2500  ;;  %vm479_vm6 = vcmp.lt.s32.totalorder %v475_v30, 2500 }
  0x54   : > { %436 = vmatprep.subr.bf16.mxu1 %v1132_v17 }
  0x56   : > { %396 = vmatpush1.bf16.msra.mxu0 %v1134_v18 }
  0x57   : > { %437 = vmatpush1.bf16.msra.mxu1 %v1135_v19 }
  0x59   : > { %1001 = vmatmul.mubr.msk.bf16.vlgmr.msra.gmra.mxu0 %vm377_vm2, %v280_v20 }
  0x5a   : > { %1002 = vmatmul.mubr.msk.bf16.vlgmr.msra.gmra.mxu1 %vm377_vm2, %v280_v20 }
 0x119   : > { %v415_v31 = vpop.f32.mrf.mxu0 }
 0x11a   : > { %v456_v32 = vpop.f32.mrf.mxu1  ;;  %v1512_v33 = vsel %vm476_vm3, %v415_v31, -1e+30 }
 0x11b   : > { %v417_v34 = vpop.f32.mrf.mxu0  ;;  %v1514_v36 = vsel %vm478_vm4, %v456_v32, -1e+30 }
 0x11c   : > { %v458_v35 = vpop.f32.mrf.mxu1  ;;  %v1516_v37 = vsel %vm477_vm5, %v417_v34, -1e+30 }
 0x11d   : > { %v1518_v38 = vsel %vm479_vm6, %v458_v35, -1e+30  ;;  %v484_v39 = vmax.f32 %v1512_v33, %v1516_v37  ;;  %v419_v41 = vpop.f32.mrf.mxu0 }
 0x11e   : > { %v485_v40 = vmax.f32 %v1514_v36, %v1518_v38  ;;  %v460_v42 = vpop.f32.mrf.mxu1 }
 0x11f   : > { %v420_v43 = vpop.f32.mrf.mxu0 }
 0x120   : > { %v461_v44 = vpop.f32.mrf.mxu1  ;;  %v486_v45 = vmax.f32 %v484_v39, %v485_v40 }
 0x122   : > { %487 = vmax.xlane.f32.xlu0 %v486_v45 }
 0x1ab   : > { %v488_v48 = vpop.xlane.xlu0 %487 }
 0x1ac   : > { %v490_v49 = vmax.f32 %v489_v46, %v488_v48  ;;  %v523_v50 = vsub.f32 %v488_v48, %v522_v47 }
 0x1ae   : > { %v492_v51 = vsub.f32 %v489_v46, %v490_v49  ;;  %521 = vst.msk [vmem:[#allocation2] sm:$0xff] %vm519_vm7, %v490_v49  ;;  %498 = vperm.xlu0 %1111, %v490_v49   ;;  %v525_v52 = vsel %vm524_vm8, %v523_v50, -inf }
 0x1af   : > { %526 = vmax.xlane.f32.xlu1 %v525_v52 }
 0x1b0   : > { %v493_v12 = vmul.f32 1.442695, %v492_v51 }
 0x229   : > { %v499_v53 = vpop.permute.xlu0 %498 }
 0x22a   : > { %v501_v54 = vsub.f32 %v1512_v33, %v499_v53  ;;  %v502_v55 = vsub.f32 %v1516_v37, %v499_v53  ;;  %v503_v56 = vsub.f32 %v1514_v36, %v499_v53  ;;  %v504_v57 = vsub.f32 %v1518_v38, %v499_v53 }
 0x22c   : > { %v505_v58 = vmul.f32 1.442695, %v501_v54  ;;  %v507_v59 = vmul.f32 1.442695, %v502_v55  ;;  %v509_v60 = vmul.f32 1.442695, %v503_v56 }
 0x22d   : > { %v511_v61 = vmul.f32 1.442695, %v504_v57 }
 0x22e   : > { %1136 = vpow2.f32 %v505_v58 }
 0x22f   : > { %1138 = vpow2.f32 %v507_v59 }
 0x230   : > { %1140 = vpow2.f32 %v509_v60 }
 0x231   : > { %1142 = vpow2.f32 %v511_v61 }
 0x232   : > { %1144 = vpow2.f32 %v493_v12 }
 0x238   : > { %v527_v62 = vpop.xlane.xlu1 %526 }
 0x239   : > { %v528_v63 = vrot.slane %v527_v62, 4 }
 0x23b   : > { %v1137_v0 = vpop.eup %1136  ;;  %v529_v1 = vmax.f32 %v527_v62, %v528_v63 }
 0x23c   : > { %v1139_v2 = vpop.eup %1138 }
 0x23d   : > { %v530_v3 = vrot.slane %v529_v1, 2  ;;  %v513_v4 = vadd.f32 %v1139_v2, %v1137_v0  ;;  %v1141_v5 = vpop.eup %1140 }
 0x23e   : > { %v1143_v8 = vpop.eup %1142 }
 0x23f   : > { %v514_v6 = vadd.f32 %v1141_v5, %v513_v4  ;;  %v531_v7 = vmax.f32 %v529_v1, %v530_v3  ;;  %v1145_v13 = vpop.eup %1144 }
 0x240   : > { %v495_v15 = vmul.f32 %v1145_v13, %v491_v14 }
 0x241   : > { %v515_v9 = vadd.f32 %v1143_v8, %v514_v6  ;;  %v532_v10 = vrot.slane %v531_v7, 1 }
 0x243   : > { %516 = vadd.xlane.f32.xlu1 %v515_v9  ;;  %v533_v11 = vmax.f32 %v531_v7, %v532_v10 }
 0x245   : > { %1014 = vpush %v533_v11 }
 0x276   : > { %s1015_s24 = spop %1014 }
 0x277   : > { %p535_p3 = scmp.gt.f32.partialorder %s1015_s24, 0.0 }
 0x278   : > { %vm543_vm9 = vcmp.ge.s32.totalorder (%p535_p3), %v1512_v33, 0  ;;  %vm544_vm10 = vcmp.ge.s32.totalorder (%p535_p3), %v1516_v37, 0  ;;  %vm545_vm11 = vcmp.ge.s32.totalorder (%p535_p3), %v1514_v36, 0  ;;  %vm546_vm12 = vcmp.ge.s32.totalorder (%p535_p3), %v1518_v38, 0 }
 0x279   : > { %v547_v18 = vsub.s32 (%p535_p3), 2147483648, %v1512_v33  ;;  %v548_v19 = vsub.s32 (%p535_p3), 2147483648, %v1516_v37  ;;  %v549_v20 = vsub.s32 (%p535_p3), 2147483648, %v1514_v36  ;;  %v550_v21 = vsub.s32 (%p535_p3), 2147483648, %v1518_v38 }
 0x27a   : > { %v559_v27 = vsub.s32 (%p535_p3), 511, %v1490_v22  ;;  %v560_v28 = vsub.s32 (%p535_p3), 511, %v1499_v25  ;;  %v561_v29 = vsub.s32 (%p535_p3), 511, %v1496_v24  ;;  %v562_v30 = vsub.s32 (%p535_p3), 511, %v1502_v26 }
 0x27b   : > { %v551_v31 = vsel (%p535_p3), %vm543_vm9, %v1512_v33, %v547_v18  ;;  %v552_v32 = vsel (%p535_p3), %vm544_vm10, %v1516_v37, %v548_v19  ;;  %v553_v34 = vsel (%p535_p3), %vm545_vm11, %v1514_v36, %v549_v20  ;;  %v554_v35 = vsel (%p535_p3), %vm546_vm12, %v1518_v38, %v550_v21 }
 0x27c   : > { %v555_v39 = vand.u32 (%p535_p3), 4294966784, %v551_v31  ;;  %v556_v40 = vand.u32 (%p535_p3), 4294966784, %v552_v32  ;;  %v557_v41 = vand.u32 (%p535_p3), 4294966784, %v553_v34  ;;  %v558_v42 = vand.u32 (%p535_p3), 4294966784, %v554_v35 }
 0x27d   : > { %vm668_vm11 = vcmask (%p535_p3), 23552   ;;  %vm670_vm12 = vcmask (%p535_p3), 31744  }
 0x27e   : > { %v563_v43 = vor.u32 (%p535_p3), %v559_v27, %v555_v39  ;;  %v564_v44 = vor.u32 (%p535_p3), %v560_v28, %v556_v40  ;;  %v565_v45 = vor.u32 (%p535_p3), %v561_v29, %v557_v41  ;;  %v566_v46 = vor.u32 (%p535_p3), %v562_v30, %v558_v42  ;;  %v674_v29 = vld [vmem:[#allocation5] sm:$0xff] (%p535_p3) }
 0x280   : > { %vm567_vm13 = vcmp.gt.s32.totalorder (%p535_p3), %v563_v43, %v564_v44  ;;  %vm569_vm14 = vcmp.gt.s32.totalorder (%p535_p3), %v565_v45, %v566_v46 }
 0x281   : > { %v568_v47 = vsel (%p535_p3), %vm567_vm13, %v563_v43, %v564_v44  ;;  %v570_v48 = vsel (%p535_p3), %vm569_vm14, %v565_v45, %v566_v46 }
 0x282   : > { %vm571_vm15 = vcmp.gt.s32.totalorder (%p535_p3), %v568_v47, %v570_v48 }
 0x283   : > { %v572_v33 = vsel (%p535_p3), %vm571_vm15, %v568_v47, %v570_v48 }
 0x284   : > { %v574_v49 = vshra.s32 (%p535_p3), %v572_v33, 16  ;;  %v573_v36 = vand.u32 (%p535_p3), 65535, %v572_v33 }
 0x286   : > { %v576_v37 = vcvt.s32.f32 (%p535_p3), %v574_v49  ;;  %v575_v50 = vcvt.s32.f32 (%p535_p3), %v573_v36 }
 0x288   : > { %577 = vmax.xlane.f32.xlu0 (%p535_p3), %v576_v37 }
 0x2cb   : > { %538 = sbr.rel (!%p535_p3) target bundleno = 2569 (0xa09), region = 44 }
 0x2cc   : > { %v517_v16 = vpop.xlane.xlu1 %516 }
 0x2cd   : > { %v518_v17 = vadd.f32 %v517_v16, %v495_v15  ;;  %v667_v15 = vld [vmem:[#allocation4] sm:$0xff] (%p535_p3) }
 0x2cf   : > { %520 = vst.msk [vmem:[#allocation3] sm:$0xff] %vm519_vm7, %v518_v17 }
 0x311   : > { %v578_v38 = vpop.xlane.xlu0 %577 }
 0x312   : > { %vm579_vm0 = vcmp.eq.f32.partialorder %v576_v37, %v578_v38  ;;  %v584_v52 = vcvt.f32.s32 %v578_v38 }
 0x313   : > { %v580_v51 = vsel %vm579_vm0, %v575_v50, -inf }
 0x314   : > { %581 = vmax.xlane.f32.xlu0 %v580_v51  ;;  %v585_v54 = vshll.u32 %v584_v52, 16 }
 0x39d   : > { %v582_v53 = vpop.xlane.xlu0 %581 }
 0x39e   : > { %v583_v55 = vcvt.f32.s32 %v582_v53 }
 0x3a0   : > { %v586_v56 = vadd.s32 %v585_v54, %v583_v55 }
 0x3a2   : > { %v587_v57 = vand.u32 511, %v586_v56  ;;  %v589_v8 = vand.u32 4294966784, %v586_v56 }
 0x3a4   : > { %v588_v58 = vsub.s32 511, %v587_v57  ;;  %v591_v11 = vsub.s32 2147483648, %v589_v8  ;;  %vm590_vm10 = vcmp.ge.s32.totalorder %v589_v8, 0 }
 0x3a6   : > { %vm595_vm1 = vcmp.eq.s32.totalorder %v1490_v22, %v588_v58  ;;  %vm596_vm2 = vcmp.eq.s32.totalorder %v1499_v25, %v588_v58  ;;  %vm597_vm3 = vcmp.eq.s32.totalorder %v1496_v24, %v588_v58  ;;  %vm598_vm4 = vcmp.eq.s32.totalorder %v1502_v26, %v588_v58 }
 0x3a7   : > { %v599_v59 = vsel %vm595_vm1, 2147483648, %v563_v43  ;;  %v600_v60 = vsel %vm596_vm2, 2147483648, %v564_v44  ;;  %v601_v61 = vsel %vm597_vm3, 2147483648, %v565_v45  ;;  %v602_v62 = vsel %vm598_vm4, 2147483648, %v566_v46 }
 0x3a8   : > { %vm603_vm5 = vcmp.gt.s32.totalorder %v599_v59, %v600_v60  ;;  %vm605_vm6 = vcmp.gt.s32.totalorder %v601_v61, %v602_v62  ;;  %v592_v16 = vsel %vm590_vm10, %v589_v8, %v591_v11  ;;  %v594_v27 = vadd.s32 %v588_v58, %v1493_v23 }
 0x3a9   : > { %v604_v63 = vsel %vm603_vm5, %v599_v59, %v600_v60  ;;  %v606_v0 = vsel %vm605_vm6, %v601_v61, %v602_v62  ;;  %v669_v21 = vsel %vm668_vm11, %v667_v15, %v592_v16  ;;  %v683_v58 = vsub.s32 7, %v1490_v22 }
 0x3aa   : > { %vm607_vm8 = vcmp.gt.s32.totalorder %v604_v63, %v606_v0  ;;  %v675_v41 = vsel %vm668_vm11, %v674_v29, %v594_v27  ;;  %vm685_vm10 = vcmask 48128  }
 0x3ab   : > { %v608_v1 = vsel %vm607_vm8, %v604_v63, %v606_v0  ;;  %vm672_vm8 = vcmask 39936  }
 0x3ac   : > { %v610_v2 = vshra.s32 %v608_v1, 16  ;;  %v609_v4 = vand.u32 65535, %v608_v1 }
 0x3ae   : > { %v612_v3 = vcvt.s32.f32 %v610_v2  ;;  %v611_v6 = vcvt.s32.f32 %v609_v4 }
 0x3b0   : > { %613 = vmax.xlane.f32.xlu1 %v612_v3 }
 0x439   : > { %v614_v5 = vpop.xlane.xlu1 %613 }
 0x43a   : > { %vm615_vm9 = vcmp.eq.f32.partialorder %v612_v3, %v614_v5  ;;  %v620_v9 = vcvt.f32.s32 %v614_v5 }
 0x43b   : > { %v616_v7 = vsel %vm615_vm9, %v611_v6, -inf }
 0x43c   : > { %617 = vmax.xlane.f32.xlu1 %v616_v7  ;;  %v621_v12 = vshll.u32 %v620_v9, 16 }
 0x4c5   : > { %v618_v10 = vpop.xlane.xlu1 %617 }
 0x4c6   : > { %v619_v13 = vcvt.f32.s32 %v618_v10 }
 0x4c8   : > { %v622_v14 = vadd.s32 %v621_v12, %v619_v13 }
 0x4ca   : > { %v623_v17 = vand.u32 511, %v622_v14  ;;  %v625_v18 = vand.u32 4294966784, %v622_v14 }
 0x4cc   : > { %v624_v19 = vsub.s32 511, %v623_v17  ;;  %vm626_vm13 = vcmp.ge.s32.totalorder %v625_v18, 0  ;;  %v627_v20 = vsub.s32 2147483648, %v625_v18 }
 0x4ce   : > { %v628_v28 = vsel %vm626_vm13, %v625_v18, %v627_v20  ;;  %vm631_vm14 = vcmp.eq.s32.totalorder %v1490_v22, %v624_v19  ;;  %vm632_vm15 = vcmp.eq.s32.totalorder %v1499_v25, %v624_v19  ;;  %vm633_vm0 = vcmp.eq.s32.totalorder %v1496_v24, %v624_v19 }
 0x4cf   : > { %v671_v30 = vsel %vm670_vm12, %v669_v21, %v628_v28  ;;  %vm634_vm1 = vcmp.eq.s32.totalorder %v1502_v26, %v624_v19  ;;  %v635_v31 = vsel %vm631_vm14, 2147483648, %v599_v59  ;;  %v636_v32 = vsel %vm632_vm15, 2147483648, %v600_v60 }
 0x4d0   : > { %v637_v34 = vsel %vm633_vm0, 2147483648, %v601_v61  ;;  %v638_v35 = vsel %vm634_vm1, 2147483648, %v602_v62  ;;  %vm639_vm2 = vcmp.gt.s32.totalorder %v635_v31, %v636_v32  ;;  %v630_v39 = vadd.s32 %v624_v19, %v1493_v23 }
 0x4d1   : > { %v640_v40 = vsel %vm639_vm2, %v635_v31, %v636_v32  ;;  %vm641_vm3 = vcmp.gt.s32.totalorder %v637_v34, %v638_v35 }
 0x4d2   : > { %v642_v42 = vsel %vm641_vm3, %v637_v34, %v638_v35  ;;  %v676_v25 = vsel %vm670_vm12, %v675_v41, %v630_v39 }
 0x4d3   : > { %vm643_vm4 = vcmp.gt.s32.totalorder %v640_v40, %v642_v42 }
 0x4d4   : > { %v644_v24 = vsel %vm643_vm4, %v640_v40, %v642_v42  ;;  %vm800_vm4 = vcmask 15360  }
 0x4d5   : > { %v646_v43 = vshra.s32 %v644_v24, 16  ;;  %v645_v26 = vand.u32 65535, %v644_v24 }
 0x4d7   : > { %v648_v44 = vcvt.s32.f32 %v646_v43  ;;  %v647_v46 = vcvt.s32.f32 %v645_v26 }
 0x4d9   : > { %649 = vmax.xlane.f32.xlu0 %v648_v44 }
 0x562   : > { %v650_v45 = vpop.xlane.xlu0 %649 }
 0x563   : > { %vm651_vm5 = vcmp.eq.f32.partialorder %v648_v44, %v650_v45  ;;  %v656_v48 = vcvt.f32.s32 %v650_v45 }
 0x564   : > { %v652_v47 = vsel %vm651_vm5, %v647_v46, -inf }
 0x565   : > { %653 = vmax.xlane.f32.xlu1 %v652_v47  ;;  %v657_v49 = vshll.u32 %v656_v48, 16 }
 0x5ee   : > { %v654_v33 = vpop.xlane.xlu1 %653 }
 0x5ef   : > { %v655_v37 = vcvt.f32.s32 %v654_v33 }
 0x5f1   : > { %v658_v36 = vadd.s32 %v657_v49, %v655_v37 }
 0x5f3   : > { %v659_v50 = vand.u32 511, %v658_v36  ;;  %v661_v38 = vand.u32 4294966784, %v658_v36 }
 0x5f5   : > { %v660_v51 = vsub.s32 511, %v659_v50  ;;  %vm662_vm6 = vcmp.ge.s32.totalorder %v661_v38, 0  ;;  %v663_v52 = vsub.s32 2147483648, %v661_v38 }
 0x5f7   : > { %v664_v53 = vsel %vm662_vm6, %v661_v38, %v663_v52  ;;  %v666_v54 = vadd.s32 %v660_v51, %v1493_v23 }
 0x5f8   : > { %v673_v55 = vsel %vm672_vm8, %v671_v30, %v664_v53 }
 0x5f9   : > { %vm679_vm9 = vcmp.ge.s32.totalorder %v673_v55, 0  ;;  %v680_v56 = vsub.s32 2147483648, %v673_v55  ;;  %v1561_v57 = vsel %vm672_vm8, %v676_v25, %v666_v54 }
 0x5fb   : > { %v681_v59 = vsel %vm679_vm9, %v673_v55, %v680_v56 }
 0x5fc   : > { %v682_v60 = vand.u32 4294967288, %v681_v59 }
 0x5fe   : > { %v684_v61 = vor.u32 %v683_v58, %v682_v60 }
 0x600   : > { %v686_v62 = vsel %vm685_vm10, %v684_v61, 2147483648 }
 0x601   : > { %v688_v63 = vshra.s32 %v686_v62, 16  ;;  %v687_v1 = vand.u32 65535, %v686_v62 }
 0x603   : > { %v690_v0 = vcvt.s32.f32 %v688_v63  ;;  %v689_v3 = vcvt.s32.f32 %v687_v1 }
 0x605   : > { %691 = vmax.xlane.f32.xlu0 %v690_v0 }
 0x68e   : > { %v692_v2 = vpop.xlane.xlu0 %691 }
 0x68f   : > { %vm693_vm12 = vcmp.eq.f32.partialorder %v690_v0, %v692_v2  ;;  %v698_v4 = vcvt.f32.s32 %v692_v2 }
 0x690   : > { %v694_v23 = vsel %vm693_vm12, %v689_v3, -inf }
 0x691   : > { %695 = vmax.xlane.f32.xlu1 %v694_v23  ;;  %v699_v6 = vshll.u32 %v698_v4, 16 }
 0x71a   : > { %v696_v5 = vpop.xlane.xlu1 %695 }
 0x71b   : > { %v697_v7 = vcvt.f32.s32 %v696_v5 }
 0x71d   : > { %v700_v8 = vadd.s32 %v699_v6, %v697_v7 }
 0x71f   : > { %v701_v9 = vand.u32 7, %v700_v8  ;;  %v703_v21 = vand.u32 4294967288, %v700_v8 }
 0x721   : > { %v702_v10 = vsub.s32 7, %v701_v9  ;;  %v705_v30 = vsub.s32 2147483648, %v703_v21  ;;  %vm704_vm15 = vcmp.ge.s32.totalorder %v703_v21, 0 }
 0x723   : > { %vm708_vm13 = vcmp.eq.s32.totalorder %v1490_v22, %v702_v10  ;;  %v706_v40 = vsel %vm704_vm15, %v703_v21, %v705_v30 }
 0x724   : > { %v723_v11 = vsel %vm708_vm13, 2147483648, %v684_v61  ;;  %v709_v39 = vsel %vm708_vm13, %v1561_v57, 0 }
 0x725   : > { %v724_v12 = vsel %vm685_vm10, %v723_v11, 2147483648  ;;  %v710_v43 = vsel %vm685_vm10, %v709_v39, 0 }
 0x726   : > { %v726_v13 = vshra.s32 %v724_v12, 16  ;;  %v725_v15 = vand.u32 65535, %v724_v12  ;;  %v712_v45 = vshrl.u32 %v710_v43, 16  ;;  %v711_v51 = vand.u32 65535, %v710_v43 }
 0x728   : > { %v728_v14 = vcvt.s32.f32 %v726_v13  ;;  %v727_v17 = vcvt.s32.f32 %v725_v15  ;;  %v714_v46 = vcvt.s32.f32 %v712_v45  ;;  %v713_v52 = vcvt.s32.f32 %v711_v51 }
 0x72a   : > { %729 = vmax.xlane.f32.xlu0 %v728_v14 }
 0x7b3   : > { %v730_v16 = vpop.xlane.xlu0 %729 }
 0x7b4   : > { %vm731_vm14 = vcmp.eq.f32.partialorder %v728_v14, %v730_v16  ;;  %v736_v19 = vcvt.f32.s32 %v730_v16 }
 0x7b5   : > { %v732_v18 = vsel %vm731_vm14, %v727_v17, -inf }
 0x7b6   : > { %733 = vmax.xlane.f32.xlu1 %v732_v18  ;;  %v737_v27 = vshll.u32 %v736_v19, 16 }
 0x83f   : > { %v734_v20 = vpop.xlane.xlu1 %733 }
 0x840   : > { %v735_v28 = vcvt.f32.s32 %v734_v20 }
 0x842   : > { %v738_v29 = vadd.s32 %v737_v27, %v735_v28 }
 0x844   : > { %v739_v31 = vand.u32 7, %v738_v29  ;;  %v741_v32 = vand.u32 4294967288, %v738_v29 }
 0x846   : > { %v740_v34 = vsub.s32 7, %v739_v31  ;;  %vm742_vm0 = vcmp.ge.s32.totalorder %v741_v32, 0  ;;  %v743_v35 = vsub.s32 2147483648, %v741_v32 }
 0x848   : > { %v744_v41 = vsel %vm742_vm0, %v741_v32, %v743_v35  ;;  %vm746_vm1 = vcmp.eq.s32.totalorder %v1490_v22, %v740_v34 }
 0x849   : > { %v799_v42 = vsel %vm519_vm7, %v706_v40, %v744_v41  ;;  %v761_v25 = vsel %vm746_vm1, 2147483648, %v723_v11  ;;  %v747_v47 = vsel %vm746_vm1, %v1561_v57, 0 }
 0x84a   : > { %v762_v24 = vsel %vm685_vm10, %v761_v25, 2147483648  ;;  %v748_v33 = vsel %vm685_vm10, %v747_v47, 0 }
 0x84b   : > { %v764_v44 = vshra.s32 %v762_v24, 16  ;;  %v763_v48 = vand.u32 65535, %v762_v24  ;;  %v750_v36 = vshrl.u32 %v748_v33, 16  ;;  %v749_v6 = vand.u32 65535, %v748_v33 }
 0x84d   : > { %v766_v26 = vcvt.s32.f32 %v764_v44  ;;  %v765_v37 = vcvt.s32.f32 %v763_v48  ;;  %v752_v38 = vcvt.s32.f32 %v750_v36  ;;  %v751_v7 = vcvt.s32.f32 %v749_v6 }
 0x84f   : > { %767 = vmax.xlane.f32.xlu0 %v766_v26 }
 0x853   : > { %717 = vadd.xlane.f32.xlu0 %v714_v46 }
 0x8d8   : > { %v768_v49 = vpop.xlane.xlu0 %767 }
 0x8d9   : > { %vm769_vm2 = vcmp.eq.f32.partialorder %v766_v26, %v768_v49  ;;  %v774_v53 = vcvt.f32.s32 %v768_v49 }
 0x8da   : > { %v770_v50 = vsel %vm769_vm2, %v765_v37, -inf }
 0x8db   : > { %771 = vmax.xlane.f32.xlu1 %v770_v50  ;;  %v775_v55 = vshll.u32 %v774_v53, 16 }
 0x8dc   : > { %v718_v9 = vpop.xlane.xlu0 %717 }
 0x8df   : > { %755 = vadd.xlane.f32.xlu1 %v752_v38 }
 0x8e3   : > { %715 = vadd.xlane.f32.xlu1 %v713_v52 }
 0x964   : > { %v772_v54 = vpop.xlane.xlu1 %771 }
 0x965   : > { %v773_v56 = vcvt.f32.s32 %v772_v54 }
 0x967   : > { %v776_v58 = vadd.s32 %v775_v55, %v773_v56 }
 0x968   : > { %v756_v8 = vpop.xlane.xlu1 %755 }
 0x969   : > { %v777_v59 = vand.u32 7, %v776_v58  ;;  %v779_v60 = vand.u32 4294967288, %v776_v58  ;;  %v758_v11 = vcvt.f32.s32 %v756_v8 }
 0x96b   : > { %v778_v61 = vsub.s32 7, %v777_v59  ;;  %vm780_vm3 = vcmp.ge.s32.totalorder %v779_v60, 0  ;;  %v781_v62 = vsub.s32 2147483648, %v779_v60  ;;  %v759_v18 = vshll.u32 %v758_v11, 16 }
 0x96d   : > { %v782_v63 = vsel %vm780_vm3, %v779_v60, %v781_v62  ;;  %vm784_vm5 = vcmp.eq.s32.totalorder %v1490_v22, %v778_v61  ;;  %v716_v22 = vpop.xlane.xlu1 %715 }
 0x96e   : > { %v785_v0 = vsel %vm784_vm5, %v1561_v57, 0  ;;  %v801_v1 = vsel %vm800_vm4, %v799_v42, %v782_v63  ;;  %v720_v57 = vcvt.f32.s32 %v718_v9  ;;  %v719_v13 = vcvt.f32.s32 %v716_v22 }
 0x96f   : > { %v786_v2 = vsel %vm685_vm10, %v785_v0, 0  ;;  %802 = vst.msk [vmem:[#allocation4] sm:$0xff] %vm668_vm11, %v801_v1 }
 0x970   : > { %v788_v3 = vshrl.u32 %v786_v2, 16  ;;  %v787_v23 = vand.u32 65535, %v786_v2  ;;  %v721_v17 = vshll.u32 %v720_v57, 16 }
 0x972   : > { %v790_v4 = vcvt.s32.f32 %v788_v3  ;;  %v789_v5 = vcvt.s32.f32 %v787_v23  ;;  %v722_v21 = vadd.s32 %v721_v17, %v719_v13 }
 0x974   : > { %793 = vadd.xlane.f32.xlu0 %v790_v4  ;;  %791 = vadd.xlane.f32.xlu1 %v789_v5 }
 0x978   : > { %753 = vadd.xlane.f32.xlu0 %v751_v7 }
 0x9fd   : > { %v794_v10 = vpop.xlane.xlu0 %793  ;;  %v792_v14 = vpop.xlane.xlu1 %791 }
 0x9fe   : > { %v796_v12 = vcvt.f32.s32 %v794_v10  ;;  %v795_v20 = vcvt.f32.s32 %v792_v14 }
 0xa00   : > { %v797_v15 = vshll.u32 %v796_v12, 16 }
 0xa01   : > { %v754_v16 = vpop.xlane.xlu0 %753 }
 0xa02   : > { %v757_v19 = vcvt.f32.s32 %v754_v16  ;;  %v798_v28 = vadd.s32 %v797_v15, %v795_v20 }
 0xa04   : > { %v760_v27 = vadd.s32 %v759_v18, %v757_v19 }
 0xa06   : > { %v803_v29 = vsel %vm519_vm7, %v722_v21, %v760_v27 }
 0xa07   : > { %v804_v30 = vsel %vm800_vm4, %v803_v29, %v798_v28 }
 0xa08   : > { %805 = vst.msk [vmem:[#allocation5] sm:$0xff] %vm668_vm11, %v804_v30 }
 0xa09 PF: > { %p1004_p4 = scmp.ne.s32.totalorder %s1329_s18, 4 }
 0xa0b   : > { %809 = sbr.rel (%p1004_p4) target bundleno = 2720 (0xaa0), region = 48 }
 0xa10   : > { %v818_v31 = vld [vmem:[#allocation3] sm:$0xff]  ;;  %v1348_v32 = vmov 0   ;;  %v810_v34 = vld [vmem:[#allocation4] sm:$0xff]  ;;  %vm811_vm6 = vcmask 23552   ;;  %v814_v35 = vld [vmem:[#allocation5] sm:$0xff] }
 0xa11   : > { %1146 = vset.pattern.permute.xlu0 %v1348_v32  ;;  %1147 = vlog2.f32 %v818_v31  ;;  %v817_v40 = vld [vmem:[#allocation2] sm:$0xff]  ;;  %v812_v41 = vsel %vm811_vm6, %v810_v34, -inf  ;;  %v815_v42 = vsel %vm811_vm6, %v814_v35, 0 }
 0xa12   : > { %813 = vst [vmem:[#allocation11] sm:$0xff] %v812_v41  ;;  %816 = vst [vmem:[#allocation12] sm:$0xff] %v815_v42 }
 0xa1e   : > { %v1148_v39 = vpop.eup %1147 }
 0xa1f   : > { %v820_v25 = vmul.f32 0.6931472, %v1148_v39 }
 0xa21   : > { %v821_v24 = vadd.f32 %v820_v25, %v817_v40 }
 0xa23   : > { %824 = vperm.xlu0 %1146, %v821_v24  }
 0xa9e   : > { %v825_v43 = vpop.permute.xlu0 %824 }
 0xa9f   : > { %827 = vst [vmem:[#allocation14] sm:$0xff] %v825_v43 }
 0xaa0 PF: > { %p1589_p6 = scmp.eq.s32.totalorder %s974_s21, 4  ;;  %s1349_s25 = smov [#allocation12]  }
 0xaa1   : > { %s852_s29 = sshll.u32 %s1349_s25, 4  ;;  %s853_s29 = int_to_ptr.vmem [resolvable:$true] %s852_s29 }
 0xaa2   : > { %s1203_s11 = scalar_lea.vmem %s853_s29, 128  ;;  %p1210_p11 = scmp.lt.s32.totalorder %s853_s29, %s853_s29 }
 0xaa3   : > { %p1204_p8 = scmp.ne.s32.totalorder %s853_s29, %s1203_s11  ;;  %p1211_p13 = scmp.lt.s32.totalorder %s1203_s11, %s1203_s11 }
 0xaa5   : > { %p1205_p9 = pnand %p1204_p8, %p1589_p6  ;;  %p1212_p0 = por %p1211_p13, %p1210_p11 }
 0xaa7   : > { %p1206_p10 = pneg %p1205_p9 }
 0xaa9   : > { %p1213_p1 = pnand %p1212_p0, %p1206_p10 }
 0xaab   : > { %1216 = shalt.err (!%p1213_p1)
}
 0xaac   : > { %1025 = dma.vmem_to_hbm [thread:$0]  (%p1589_p6), %s853_s29, 128, %s1643_s3, [#allocation13]  }
 0xaad   : > { %s1350_s27 = smov [#allocation11]   ;;  %s1351_s5 = smov [#allocation14]  }
 0xaae   : > { %s838_s30 = sshll.u32 %s1350_s27, 4  ;;  %s866_s6 = sshll.u32 %s1351_s5, 4  ;;  %s839_s30 = int_to_ptr.vmem [resolvable:$true] %s838_s30  ;;  %s867_s6 = int_to_ptr.vmem [resolvable:$true] %s866_s6 }
 0xaaf   : > { %s1227_s8 = scalar_lea.vmem %s839_s30, 128  ;;  %p1234_p12 = scmp.lt.s32.totalorder %s839_s30, %s839_s30 }
 0xab0   : > { %p1228_p2 = scmp.ne.s32.totalorder %s839_s30, %s1227_s8  ;;  %p1235_p3 = scmp.lt.s32.totalorder %s1227_s8, %s1227_s8 }
 0xab2   : > { %p1229_p5 = pnand %p1228_p2, %p1589_p6  ;;  %p1236_p4 = por %p1235_p3, %p1234_p12 }
 0xab4   : > { %p1230_p7 = pneg %p1229_p5 }
 0xab6   : > { %p1237_p8 = pnand %p1236_p4, %p1230_p7 }
 0xab8   : > { %1240 = shalt.err (!%p1237_p8)
}
 0xab9   : > { %1023 = dma.vmem_to_hbm [thread:$0]  (%p1589_p6), %s839_s30, 128, %s1642_s2, [#allocation8]  }
 0xaba   : > { %s1251_s10 = scalar_lea.vmem %s867_s6, 128  ;;  %p1258_p13 = scmp.lt.s32.totalorder %s867_s6, %s867_s6 }
 0xabb   : > { %p1252_p9 = scmp.ne.s32.totalorder %s867_s6, %s1251_s10  ;;  %p1259_p0 = scmp.lt.s32.totalorder %s1251_s10, %s1251_s10 }
 0xabd   : > { %p1253_p10 = pnand %p1252_p9, %p1589_p6  ;;  %p1260_p1 = por %p1259_p0, %p1258_p13 }
 0xabf   : > { %p1254_p11 = pneg %p1253_p10 }
 0xac1   : > { %p1261_p2 = pnand %p1260_p1, %p1254_p11 }
 0xac3   : > { %1264 = shalt.err (!%p1261_p2)
}
 0xac4   : > { %1027 = dma.vmem_to_hbm [thread:$0]  (%p1589_p6), %s867_s6, 128, %s1644_s4, [#allocation13]  }
 0xac5   : > { %1308 = dma.done.wait (%p1589_p6), [#allocation8], 128  }
 0xac6   : > { %1310 = vsyncadd (%p1589_p6), [#allocation8], 4294967168 }
 0xac7   : > { %1312 = dma.done.wait (%p1589_p6), [#allocation13], 256  }
 0xac8   : > { %1314 = vsyncadd (%p1589_p6), [#allocation13], 4294967040 }
 0xac9 PF: > { %s21_s20 = sadd.s32 1, %s1337_s20   ;;  %s1654_s15 = smov %s1321_s16 }
 0xaca   : > { %p18_p5 = scmp.ge.s32.totalorder %s21_s20, 7   ;;  %s1655_s16 = smov %s1325_s17 }
 0xacb   : > { %s1656_s17 = smov %s1454_s26  ;;  %s1657_s18 = smov %s1333_s19 }
 0xacc   : > { %s1658_s19 = smov %s1660_s7  ;;  %20 = sbr.rel (!%p18_p5) target bundleno = 7 (0x7), region = 102 }
 0xad1   :  { %887 = vsyncpa [#allocation7], 1 }
 0xad2   :  { %889 = vsyncpa [#allocation7 + $0x1], 1 }
 0xad3   :  { %890 = vsyncpa [#allocation10], 1 }
 0xad4   :  { %892 = vsyncpa [#allocation10 + $0x1], 1 }
 0xad5   :  { %893 = vsyncpa [#allocation8], 1 }
 0xad6   :  { %895 = vsyncpa [#allocation8 + $0x1], 1 }
 0xad7   :  { %896 = vsyncpa [#allocation13], 1 }

</bundles_post_ra>
